<compile_context>
chip_gen: v7x
topology: tpu7x:2x2x1
jax: 0.10.0
libtpu: 0.0.40
codegen_flags: <defaults>
</compile_context>

<pallas_src>
from functools import partial

import numpy as np
import jax
import jax.numpy as jnp
from jax.experimental import pallas as pl
from jax.experimental.pallas import tpu as pltpu


def _round_up(x, m):
    return ((x + m - 1) // m) * m


# -----------------------------------------------------------------------------
# Host-side precompute of the spherical-harmonic transform matrices (buffers of
# the injected RealSHT / InverseRealSHT dependencies; "legendre-gauss" grid,
# norm="ortho", csphase=True, lmax=nlat, mmax=nlon//2+1).
# -----------------------------------------------------------------------------
def _precompute_legpoly(mmax, lmax, theta, csphase=True):
    """Fully-normalized associated Legendre polys P̄_l^m(cos θ); vdm[m, l, k]."""
    nmax = max(mmax, lmax)
    vdm = np.zeros((nmax, nmax, len(theta)), dtype=np.float64)
    cost = np.cos(theta)
    vdm[0, 0, :] = 1.0 / np.sqrt(4.0 * np.pi)
    for l in range(1, nmax):
        vdm[l - 1, l] = np.sqrt(2 * l + 1) * cost * vdm[l - 1, l - 1]
        vdm[l, l] = np.sqrt((2 * l + 1) * (1 + cost) * (1 - cost) / (2 * l)) * vdm[l - 1, l - 1]
    for l in range(2, nmax):
        for m in range(0, l - 1):
            vdm[m, l] = (cost * np.sqrt((2 * l - 1) / (l - m) * (2 * l + 1) / (l + m)) * vdm[m, l - 1]
                         - np.sqrt((l + m - 1) / (l - m) * (2 * l + 1) / (2 * l - 3)
                                   * (l - m - 1) / (l + m)) * vdm[m, l - 2])
    vdm = vdm[:mmax, :lmax]
    if csphase:
        for m in range(1, mmax, 2):
            vdm[m] *= -1.0
    return vdm


def _sht_matrices(nlat, nlon):
    """Dense forward / inverse SHT matrices.

    forward:  x(C, H*W) @ Fr -> real coeffs (C, L*M),  @ Fi -> imag coeffs
    inverse:  Zr @ Gr + Zi @ Gi -> x(C, H*W)
    Matches: 2π·rfft(norm='forward') + einsum('...km,mlk->...lm', ·, legpoly·quad)
             / einsum('...lm,mlk->...km', ·, legpoly) + irfft(n=nlon, norm='forward').
    """
    lmax, mmax = nlat, nlon // 2 + 1
    cost, wq = np.polynomial.legendre.leggauss(nlat)        # Gauss-Legendre nodes/weights
    theta = np.flip(np.arccos(cost))
    pct = _precompute_legpoly(mmax, lmax, theta)             # (M, L, K)
    lw = pct * wq[np.newaxis, np.newaxis, :]                 # forward: include quadrature
    lp = pct                                                 # inverse (ortho norm)

    m = np.arange(mmax)
    w = np.arange(nlon)
    ang = 2.0 * np.pi * np.outer(w, m) / nlon                # (W, M)
    cf = (2.0 * np.pi / nlon) * np.cos(ang)                  # 2π * rfft(norm='forward')
    sf = -(2.0 * np.pi / nlon) * np.sin(ang)
    cm = np.where((m == 0) | (m == nlon // 2), 1.0, 2.0)     # hermitian doubling for irfft
    icr = cm[:, None] * np.cos(ang.T)                        # (M, W)
    ici = -cm[:, None] * np.sin(ang.T)

    fr = np.einsum('mlk,wm->kwlm', lw, cf).reshape(nlat * nlon, lmax * mmax)
    fi = np.einsum('mlk,wm->kwlm', lw, sf).reshape(nlat * nlon, lmax * mmax)
    gr = np.einsum('mlk,mw->lmkw', lp, icr).reshape(lmax * mmax, nlat * nlon)
    gi = np.einsum('mlk,mw->lmkw', lp, ici).reshape(lmax * mmax, nlat * nlon)
    return (jnp.asarray(fr, jnp.float32), jnp.asarray(fi, jnp.float32),
            jnp.asarray(gr, jnp.float32), jnp.asarray(gi, jnp.float32))


# -----------------------------------------------------------------------------
# Pallas kernel: one batch element per grid program.
# -----------------------------------------------------------------------------
def _sfno_block_kernel(x_ref,                      # (1, C, HW) f32
                       n0w_ref, n0b_ref,           # (1, HW)  norm0 affine (flattened (H,W))
                       f_ref,                      # (HW, 2*LMp) bf16  fused forward SHT [fr|fi]
                       w0a_ref, w0b_ref,           # (2Hs, C) f32  spectral layer 0 (split form)
                       w1_ref, w2_ref,             # (2Hs, 2Hs) f32  block complex weights
                       wo_ref,                     # (2C, 2Hs) f32   block wout
                       g_ref,                      # (2*LMp, HW) bf16 fused inverse SHT [gr;gi]
                       wsk_ref, bsk_ref,           # (C, C), (C, 1)  inner_skip 1x1 conv
                       n1w_ref, n1b_ref,           # (1, HW)  norm1 affine
                       wfc1_ref, bfc1_ref,         # (Hm, C), (Hm, 1)  MLP fc1
                       wfc2_ref, bfc2_ref,         # (C, Hm), (C, 1)   MLP fc2
                       o_ref,                      # (1, C, HW) f32
                       res_ref):                   # VMEM scratch (C, HW) f32 -- residual
    f32 = jnp.float32
    bf16 = jnp.bfloat16
    C = x_ref.shape[1]
    LMp = f_ref.shape[1] // 2            # lane-padded spectral width (multiple of 128)

    x = x_ref[0].astype(f32)                                   # (C, HW)

    # ---- norm0: LayerNorm over spatial dims (H, W), eps=1e-6, affine ----
    mu = jnp.mean(x, axis=-1, keepdims=True)
    var = jnp.mean((x - mu) ** 2, axis=-1, keepdims=True)
    xn = (x - mu) * jax.lax.rsqrt(var + 1e-6) * n0w_ref[...] + n0b_ref[...]
    res_ref[...] = xn                                           # SpectralAttentionS2 residual

    # ---- forward SHT: single fused bf16 matmul, f32 accumulation ----
    # y = [yr | yi] lane-concatenated, (C, 2*LMp); padded lanes are exactly zero.
    y = jnp.dot(xn.astype(bf16), f_ref[...], preferred_element_type=f32)
    yr = y[:, :LMp]
    yi = y[:, LMp:]

    # ---- spectral MLP ("diagonal" complex channel mixing) + ComplexReLU('real') ----
    # state s = [zr ; zi] stacked on sublanes, (2*hidden, LMp)
    s = (jnp.dot(w0a_ref[...], yr, preferred_element_type=f32)
         + jnp.dot(w0b_ref[...], yi, preferred_element_type=f32))
    s = jnp.maximum(s, 0.0)
    s = jnp.maximum(jnp.dot(w1_ref[...], s, preferred_element_type=f32), 0.0)
    s = jnp.maximum(jnp.dot(w2_ref[...], s, preferred_element_type=f32), 0.0)
    z = jnp.dot(wo_ref[...], s, preferred_element_type=f32)     # (2C, LMp) = [zr ; zi]

    # ---- inverse SHT: single fused bf16 matmul on [zr | zi] (lane-concat) ----
    z_cat = jnp.concatenate([z[:C, :], z[C:, :]], axis=1).astype(bf16)   # (C, 2*LMp)
    xf = jnp.dot(z_cat, g_ref[...], preferred_element_type=f32)          # (C, HW)

    # ---- inner skip: x = x + Conv2d1x1(residual) ----
    skip = jnp.dot(wsk_ref[...], res_ref[...], preferred_element_type=f32) + bsk_ref[...]
    x2 = xf + skip

    # ---- norm1 ----
    mu2 = jnp.mean(x2, axis=-1, keepdims=True)
    var2 = jnp.mean((x2 - mu2) ** 2, axis=-1, keepdims=True)
    x3 = (x2 - mu2) * jax.lax.rsqrt(var2 + 1e-6) * n1w_ref[...] + n1b_ref[...]

    # ---- MLP: Conv2d1x1 -> GELU(exact erf) -> Conv2d1x1 ----
    h = jnp.dot(wfc1_ref[...], x3, preferred_element_type=f32) + bfc1_ref[...]
    h = 0.5 * h * (1.0 + jax.lax.erf(h * np.float32(1.0 / np.sqrt(2.0))))
    out = jnp.dot(wfc2_ref[...], h, preferred_element_type=f32) + bfc2_ref[...]

    # outer_skip=None, drop_path=Identity -> return as-is
    o_ref[0] = out.astype(o_ref.dtype)


# -----------------------------------------------------------------------------
# Wrapper
# -----------------------------------------------------------------------------
def sfno_block_forward(x, kp):
    B, C, H, W = x.shape
    HW = H * W
    x2d = jnp.asarray(x, jnp.float32).reshape(B, C, HW)

    names = ['n0w', 'n0b', 'F', 'W0a', 'W0b', 'W1', 'W2', 'Wo', 'G',
             'wsk', 'bsk', 'n1w', 'n1b', 'wfc1', 'bfc1', 'wfc2', 'bfc2']
    params = [kp[k] for k in names]

    def const_spec(arr):
        zeros = (0,) * arr.ndim
        return pl.BlockSpec(arr.shape, lambda b, _z=zeros: _z)

    in_specs = [pl.BlockSpec((1, C, HW), lambda b: (b, 0, 0))]
    in_specs += [const_spec(a) for a in params]

    out = pl.pallas_call(
        _sfno_block_kernel,
        out_shape=jax.ShapeDtypeStruct((B, C, HW), jnp.float32),
        grid=(B,),
        in_specs=in_specs,
        out_specs=pl.BlockSpec((1, C, HW), lambda b: (b, 0, 0)),
        scratch_shapes=[pltpu.VMEM((C, HW), jnp.float32)],
        compiler_params=pltpu.CompilerParams(dimension_semantics=("parallel",)),
    )(x2d, *params)
    return out.reshape(B, C, H, W)


# -----------------------------------------------------------------------------
# Deterministic parameter construction (shapes from the module __init__)
# -----------------------------------------------------------------------------
def build_params(key, C, H, W, mlp_ratio=2.0):
    HW = H * W
    Hs = int(mlp_ratio * C)        # spectral MLP hidden size
    Hm = int(mlp_ratio * C)        # MLP hidden dim
    ks = jax.random.split(key, 16)

    def rn(k, shape, s):
        return s * jax.random.normal(k, shape, dtype=jnp.float32)

    fr, fi, gr, gi = _sht_matrices(H, W)

    # spectral complex weights: PyTorch shapes (in, out, 2); stored transposed (out, in)
    w0 = rn(ks[0], (C, Hs, 2), 0.4 / np.sqrt(C))
    w1 = rn(ks[1], (Hs, Hs, 2), 0.4 / np.sqrt(Hs))
    w2 = rn(ks[2], (Hs, Hs, 2), 0.4 / np.sqrt(Hs))
    wo = rn(ks[3], (Hs, C, 2), 0.4 / np.sqrt(Hs))

    p = {
        'fr': fr, 'fi': fi, 'gr': gr, 'gi': gi,
        # LayerNorm((H, W)) affine, flattened
        'n0w': (1.0 + rn(ks[4], (1, HW), 0.1)), 'n0b': rn(ks[5], (1, HW), 0.1),
        'n1w': (1.0 + rn(ks[6], (1, HW), 0.1)), 'n1b': rn(ks[7], (1, HW), 0.1),
        # spectral MLP (real / imag, transposed to (out, in))
        'w0r': w0[..., 0].T, 'w0i': w0[..., 1].T,
        'w1r': w1[..., 0].T, 'w1i': w1[..., 1].T,
        'w2r': w2[..., 0].T, 'w2i': w2[..., 1].T,
        'wor': wo[..., 0].T, 'woi': wo[..., 1].T,
        # inner_skip Conv2d(C, C, 1) weight (C, C, 1, 1) -> (C, C), bias (C,) -> (C, 1)
        'wsk': rn(ks[8], (C, C), 0.2), 'bsk': rn(ks[9], (C, 1), 0.1),
        # MLP Conv2d(C, Hm, 1) and Conv2d(Hm, C, 1)
        'wfc1': rn(ks[10], (Hm, C), 0.3), 'bfc1': rn(ks[11], (Hm, 1), 0.1),
        'wfc2': rn(ks[12], (C, Hm), 0.3), 'bfc2': rn(ks[13], (C, 1), 0.1),
    }
    return p


def pack_kernel_params(p, C, H, W):
    """Fold the raw parameters into the fused / lane-padded / bf16 kernel layout."""
    LM = p['fr'].shape[1]
    LMp = _round_up(LM, 128)
    bf16 = jnp.bfloat16

    def pad_cols(a):      # (HW, LM) -> (HW, LMp)
        return jnp.pad(a, ((0, 0), (0, LMp - LM)))

    def pad_rows(a):      # (LM, HW) -> (LMp, HW)
        return jnp.pad(a, ((0, LMp - LM), (0, 0)))

    # fused SHT matrices (bf16 storage, f32 accumulation inside the kernel)
    F = jnp.concatenate([pad_cols(p['fr']), pad_cols(p['fi'])], axis=1).astype(bf16)
    G = jnp.concatenate([pad_rows(p['gr']), pad_rows(p['gi'])], axis=0).astype(bf16)

    def blk(wr, wi):      # [[wr, -wi], [wi, wr]]
        top = jnp.concatenate([wr, -wi], axis=1)
        bot = jnp.concatenate([wi, wr], axis=1)
        return jnp.concatenate([top, bot], axis=0)

    kp = {
        'n0w': p['n0w'], 'n0b': p['n0b'], 'n1w': p['n1w'], 'n1b': p['n1b'],
        'F': F, 'G': G,
        # layer 0 consumes the lane-concatenated SHT output -> split block form
        'W0a': jnp.concatenate([p['w0r'], p['w0i']], axis=0),    # (2Hs, C)
        'W0b': jnp.concatenate([-p['w0i'], p['w0r']], axis=0),   # (2Hs, C)
        'W1': blk(p['w1r'], p['w1i']),                            # (2Hs, 2Hs)
        'W2': blk(p['w2r'], p['w2i']),                            # (2Hs, 2Hs)
        'Wo': blk(p['wor'], p['woi']),                            # (2C, 2Hs)
        'wsk': p['wsk'], 'bsk': p['bsk'],
        'wfc1': p['wfc1'], 'bfc1': p['bfc1'],
        'wfc2': p['wfc2'], 'bfc2': p['bfc2'],
    }
    return kp


# -----------------------------------------------------------------------------
# Pure-JAX reference: ORIGINAL unfused math (separate fr/fi/gr/gi, 4-matmul complex
# mixing, no lane padding).  The only concession to the kernel's bf16 MXU path is
# that the SHT operands are rounded to bf16 at the same two points, so the check
# validates the fusion/padding algebra and the kernel implementation, not bf16 error.
# -----------------------------------------------------------------------------
def reference_forward(x, p):
    B, C, H, W = x.shape
    f32 = jnp.float32
    q = lambda a: a.astype(jnp.bfloat16).astype(f32)

    xb = jnp.asarray(x, f32).reshape(B, C, H * W)
    mu = xb.mean(-1, keepdims=True)
    var = ((xb - mu) ** 2).mean(-1, keepdims=True)
    xn = (xb - mu) / jnp.sqrt(var + 1e-6) * p['n0w'][None] + p['n0b'][None]
    res = xn

    xq = q(xn)
    yr = jnp.einsum('bcs,sk->bck', xq, q(p['fr']))
    yi = jnp.einsum('bcs,sk->bck', xq, q(p['fi']))

    def cmix(ar, ai, wr, wi):
        zr = jnp.einsum('oc,bck->bok', wr, ar) - jnp.einsum('oc,bck->bok', wi, ai)
        zi = jnp.einsum('oc,bck->bok', wr, ai) + jnp.einsum('oc,bck->bok', wi, ar)
        return zr, zi

    zr, zi = cmix(yr, yi, p['w0r'], p['w0i']); zr, zi = jax.nn.relu(zr), jax.nn.relu(zi)
    zr, zi = cmix(zr, zi, p['w1r'], p['w1i']); zr, zi = jax.nn.relu(zr), jax.nn.relu(zi)
    zr, zi = cmix(zr, zi, p['w2r'], p['w2i']); zr, zi = jax.nn.relu(zr), jax.nn.relu(zi)
    zr, zi = cmix(zr, zi, p['wor'], p['woi'])

    xf = (jnp.einsum('bck,ks->bcs', q(zr), q(p['gr']))
          + jnp.einsum('bck,ks->bcs', q(zi), q(p['gi'])))
    x2 = xf + jnp.einsum('oc,bcs->bos', p['wsk'], res) + p['bsk'][None]
    mu2 = x2.mean(-1, keepdims=True)
    var2 = ((x2 - mu2) ** 2).mean(-1, keepdims=True)
    x3 = (x2 - mu2) / jnp.sqrt(var2 + 1e-6) * p['n1w'][None] + p['n1b'][None]
    h = jnp.einsum('hc,bcs->bhs', p['wfc1'], x3) + p['bfc1'][None]
    h = 0.5 * h * (1.0 + jax.lax.erf(h / np.sqrt(2.0)))
    out = jnp.einsum('ch,bhs->bcs', p['wfc2'], h) + p['bfc2'][None]
    return out.reshape(B, C, H, W)


if __name__ == "__main__":
    B, C, H, W = 2, 8, 8, 16          # NCHW; embed_dim=8, nlat=8, nlon=16
    key = jax.random.PRNGKey(0)
    kx, kp_key = jax.random.split(key)
    x = jax.random.normal(kx, (B, C, H, W), dtype=jnp.float32)
    params = build_params(kp_key, C, H, W, mlp_ratio=2.0)
    kparams = pack_kernel_params(params, C, H, W)

    out = sfno_block_forward(x, kparams)
    out = jax.block_until_ready(out)

    assert out.shape == (B, C, H, W)
    assert bool(jnp.all(jnp.isfinite(out)))

    ref = reference_forward(x, params)
    err = float(jnp.max(jnp.abs(out - ref)))
    # Tolerance allows for rare bf16 rounding-boundary divergence caused by different
    # f32 accumulation order (MXU vs XLA) at the two quantization points; genuine bugs
    # produce O(1) errors.
    if err > 2e-2:
        raise AssertionError(f"kernel/reference mismatch: max abs err = {err}")
    print("KERNEL_OK")
</pallas_src>

<mosaic_0001>
module attributes {stable_mosaic.version = 11 : i64} {
  func.func @_sfno_block_kernel(%arg0: i32, %arg1: memref<1x8x128xf32, #tpu.memory_space<vmem>>, %arg2: memref<1x128xf32, #tpu.memory_space<vmem>>, %arg3: memref<1x128xf32, #tpu.memory_space<vmem>>, %arg4: memref<128x256xbf16, #tpu.memory_space<vmem>>, %arg5: memref<32x8xf32, #tpu.memory_space<vmem>>, %arg6: memref<32x8xf32, #tpu.memory_space<vmem>>, %arg7: memref<32x32xf32, #tpu.memory_space<vmem>>, %arg8: memref<32x32xf32, #tpu.memory_space<vmem>>, %arg9: memref<16x32xf32, #tpu.memory_space<vmem>>, %arg10: memref<256x128xbf16, #tpu.memory_space<vmem>>, %arg11: memref<8x8xf32, #tpu.memory_space<vmem>>, %arg12: memref<8x1xf32, #tpu.memory_space<vmem>>, %arg13: memref<1x128xf32, #tpu.memory_space<vmem>>, %arg14: memref<1x128xf32, #tpu.memory_space<vmem>>, %arg15: memref<16x8xf32, #tpu.memory_space<vmem>>, %arg16: memref<16x1xf32, #tpu.memory_space<vmem>>, %arg17: memref<8x16xf32, #tpu.memory_space<vmem>>, %arg18: memref<8x1xf32, #tpu.memory_space<vmem>>, %arg19: memref<1x8x128xf32, #tpu.memory_space<vmem>>, %arg20: memref<8x128xf32, #tpu.memory_space<vmem>>) attributes {dimension_semantics = [#tpu.dimension_semantics<parallel>], iteration_bounds = array<i64: 2>, scalar_prefetch = 0 : i64, scratch_operands = 1 : i64, tpu.core_type = #tpu.core_type<tc>, window_params = [{transform_indices = @transform_0, window_bounds = array<i64: 1, 8, 128>}, {pipeline_mode = #tpu.pipeline_mode<synchronous>, transform_indices = @transform_1, window_bounds = array<i64: 1, 128>}, {pipeline_mode = #tpu.pipeline_mode<synchronous>, transform_indices = @transform_2, window_bounds = array<i64: 1, 128>}, {pipeline_mode = #tpu.pipeline_mode<synchronous>, transform_indices = @transform_3, window_bounds = array<i64: 128, 256>}, {pipeline_mode = #tpu.pipeline_mode<synchronous>, transform_indices = @transform_4, window_bounds = array<i64: 32, 8>}, {pipeline_mode = #tpu.pipeline_mode<synchronous>, transform_indices = @transform_5, window_bounds = array<i64: 32, 8>}, {pipeline_mode = #tpu.pipeline_mode<synchronous>, transform_indices = @transform_6, window_bounds = array<i64: 32, 32>}, {pipeline_mode = #tpu.pipeline_mode<synchronous>, transform_indices = @transform_7, window_bounds = array<i64: 32, 32>}, {pipeline_mode = #tpu.pipeline_mode<synchronous>, transform_indices = @transform_8, window_bounds = array<i64: 16, 32>}, {pipeline_mode = #tpu.pipeline_mode<synchronous>, transform_indices = @transform_9, window_bounds = array<i64: 256, 128>}, {pipeline_mode = #tpu.pipeline_mode<synchronous>, transform_indices = @transform_10, window_bounds = array<i64: 8, 8>}, {pipeline_mode = #tpu.pipeline_mode<synchronous>, transform_indices = @transform_11, window_bounds = array<i64: 8, 1>}, {pipeline_mode = #tpu.pipeline_mode<synchronous>, transform_indices = @transform_12, window_bounds = array<i64: 1, 128>}, {pipeline_mode = #tpu.pipeline_mode<synchronous>, transform_indices = @transform_13, window_bounds = array<i64: 1, 128>}, {pipeline_mode = #tpu.pipeline_mode<synchronous>, transform_indices = @transform_14, window_bounds = array<i64: 16, 8>}, {pipeline_mode = #tpu.pipeline_mode<synchronous>, transform_indices = @transform_15, window_bounds = array<i64: 16, 1>}, {pipeline_mode = #tpu.pipeline_mode<synchronous>, transform_indices = @transform_16, window_bounds = array<i64: 8, 16>}, {pipeline_mode = #tpu.pipeline_mode<synchronous>, transform_indices = @transform_17, window_bounds = array<i64: 8, 1>}, {transform_indices = @transform_18, window_bounds = array<i64: 1, 8, 128>}]} {
    %c0 = arith.constant 0 : index
    %c0_0 = arith.constant 0 : index
    %c0_1 = arith.constant 0 : index
    %0 = vector.load %arg1[%c0, %c0_0, %c0_1] : memref<1x8x128xf32, #tpu.memory_space<vmem>>, vector<1x8x128xf32>
    %1 = vector.shape_cast %0 : vector<1x8x128xf32> to vector<8x128xf32>
    %cst = arith.constant dense<0.000000e+00> : vector<8xf32>
    %2 = vector.multi_reduction <add>, %1, %cst [1] : vector<8x128xf32> to vector<8xf32>
    %3 = vector.shape_cast %2 : vector<8xf32> to vector<8x1xf32>
    %cst_2 = arith.constant 1.280000e+02 : f32
    %4 = vector.broadcast %cst_2 : f32 to vector<8x1xf32>
    %5 = arith.divf %3, %4 : vector<8x1xf32>
    %6 = vector.broadcast %5 : vector<8x1xf32> to vector<8x128xf32>
    %7 = arith.subf %1, %6 : vector<8x128xf32>
    %8 = arith.mulf %7, %7 : vector<8x128xf32>
    %cst_3 = arith.constant dense<0.000000e+00> : vector<8xf32>
    %9 = vector.multi_reduction <add>, %8, %cst_3 [1] : vector<8x128xf32> to vector<8xf32>
    %10 = vector.shape_cast %9 : vector<8xf32> to vector<8x1xf32>
    %cst_4 = arith.constant 1.280000e+02 : f32
    %11 = vector.broadcast %cst_4 : f32 to vector<8x1xf32>
    %12 = arith.divf %10, %11 : vector<8x1xf32>
    %13 = vector.broadcast %5 : vector<8x1xf32> to vector<8x128xf32>
    %14 = arith.subf %1, %13 : vector<8x128xf32>
    %cst_5 = arith.constant 9.99999997E-7 : f32
    %15 = vector.broadcast %cst_5 : f32 to vector<8x1xf32>
    %16 = arith.addf %12, %15 : vector<8x1xf32>
    %17 = math.rsqrt %16 : vector<8x1xf32>
    %18 = vector.broadcast %17 : vector<8x1xf32> to vector<8x128xf32>
    %19 = arith.mulf %14, %18 : vector<8x128xf32>
    %c0_6 = arith.constant 0 : index
    %c0_7 = arith.constant 0 : index
    %20 = vector.load %arg2[%c0_6, %c0_7] : memref<1x128xf32, #tpu.memory_space<vmem>>, vector<1x128xf32>
    %21 = vector.broadcast %20 : vector<1x128xf32> to vector<8x128xf32>
    %22 = arith.mulf %19, %21 : vector<8x128xf32>
    %c0_8 = arith.constant 0 : index
    %c0_9 = arith.constant 0 : index
    %23 = vector.load %arg3[%c0_8, %c0_9] : memref<1x128xf32, #tpu.memory_space<vmem>>, vector<1x128xf32>
    %24 = vector.broadcast %23 : vector<1x128xf32> to vector<8x128xf32>
    %25 = arith.addf %22, %24 : vector<8x128xf32>
    %c0_10 = arith.constant 0 : index
    %c0_11 = arith.constant 0 : index
    %26 = vector.load %arg20[%c0_10, %c0_11] : memref<8x128xf32, #tpu.memory_space<vmem>>, vector<8x128xf32>
    tpu.vector_store %arg20[%c0_10, %c0_11], %25 {strides = array<i32>} : memref<8x128xf32, #tpu.memory_space<vmem>>, vector<8x128xf32>,
    %27 = arith.truncf %25 : vector<8x128xf32> to vector<8x128xbf16>
    %c0_12 = arith.constant 0 : index
    %c0_13 = arith.constant 0 : index
    %28 = vector.load %arg4[%c0_12, %c0_13] : memref<128x256xbf16, #tpu.memory_space<vmem>>, vector<128x256xbf16>
    %cst_14 = arith.constant dense<0.000000e+00> : vector<8x256xf32>
    %29 = tpu.matmul %27, %28, %cst_14 {dimension_numbers = #tpu.dot_dimension_numbers<[1], [0], [0], [1], [0, 0, 1, 1], [], []>} : vector<8x128xbf16>, vector<128x256xbf16>, vector<8x256xf32> -> vector<8x256xf32>
    %30 = vector.extract_strided_slice %29 {offsets = [0, 0], sizes = [8, 128], strides = [1, 1]} : vector<8x256xf32> to vector<8x128xf32>
    %31 = vector.extract_strided_slice %29 {offsets = [0, 128], sizes = [8, 128], strides = [1, 1]} : vector<8x256xf32> to vector<8x128xf32>
    %c0_15 = arith.constant 0 : index
    %c0_16 = arith.constant 0 : index
    %32 = vector.load %arg5[%c0_15, %c0_16] : memref<32x8xf32, #tpu.memory_space<vmem>>, vector<32x8xf32>
    %cst_17 = arith.constant dense<0.000000e+00> : vector<32x128xf32>
    %33 = tpu.matmul %32, %30, %cst_17 {dimension_numbers = #tpu.dot_dimension_numbers<[1], [0], [0], [1], [0, 0, 1, 1], [], []>} : vector<32x8xf32>, vector<8x128xf32>, vector<32x128xf32> -> vector<32x128xf32>
    %c0_18 = arith.constant 0 : index
    %c0_19 = arith.constant 0 : index
    %34 = vector.load %arg6[%c0_18, %c0_19] : memref<32x8xf32, #tpu.memory_space<vmem>>, vector<32x8xf32>
    %cst_20 = arith.constant dense<0.000000e+00> : vector<32x128xf32>
    %35 = tpu.matmul %34, %31, %cst_20 {dimension_numbers = #tpu.dot_dimension_numbers<[1], [0], [0], [1], [0, 0, 1, 1], [], []>} : vector<32x8xf32>, vector<8x128xf32>, vector<32x128xf32> -> vector<32x128xf32>
    %36 = arith.addf %33, %35 : vector<32x128xf32>
    %cst_21 = arith.constant 0.000000e+00 : f32
    %37 = vector.broadcast %cst_21 : f32 to vector<32x128xf32>
    %38 = arith.maximumf %36, %37 : vector<32x128xf32>
    %c0_22 = arith.constant 0 : index
    %c0_23 = arith.constant 0 : index
    %39 = vector.load %arg7[%c0_22, %c0_23] : memref<32x32xf32, #tpu.memory_space<vmem>>, vector<32x32xf32>
    %cst_24 = arith.constant dense<0.000000e+00> : vector<32x128xf32>
    %40 = tpu.matmul %39, %38, %cst_24 {dimension_numbers = #tpu.dot_dimension_numbers<[1], [0], [0], [1], [0, 0, 1, 1], [], []>} : vector<32x32xf32>, vector<32x128xf32>, vector<32x128xf32> -> vector<32x128xf32>
    %cst_25 = arith.constant 0.000000e+00 : f32
    %41 = vector.broadcast %cst_25 : f32 to vector<32x128xf32>
    %42 = arith.maximumf %40, %41 : vector<32x128xf32>
    %c0_26 = arith.constant 0 : index
    %c0_27 = arith.constant 0 : index
    %43 = vector.load %arg8[%c0_26, %c0_27] : memref<32x32xf32, #tpu.memory_space<vmem>>, vector<32x32xf32>
    %cst_28 = arith.constant dense<0.000000e+00> : vector<32x128xf32>
    %44 = tpu.matmul %43, %42, %cst_28 {dimension_numbers = #tpu.dot_dimension_numbers<[1], [0], [0], [1], [0, 0, 1, 1], [], []>} : vector<32x32xf32>, vector<32x128xf32>, vector<32x128xf32> -> vector<32x128xf32>
    %cst_29 = arith.constant 0.000000e+00 : f32
    %45 = vector.broadcast %cst_29 : f32 to vector<32x128xf32>
    %46 = arith.maximumf %44, %45 : vector<32x128xf32>
    %c0_30 = arith.constant 0 : index
    %c0_31 = arith.constant 0 : index
    %47 = vector.load %arg9[%c0_30, %c0_31] : memref<16x32xf32, #tpu.memory_space<vmem>>, vector<16x32xf32>
    %cst_32 = arith.constant dense<0.000000e+00> : vector<16x128xf32>
    %48 = tpu.matmul %47, %46, %cst_32 {dimension_numbers = #tpu.dot_dimension_numbers<[1], [0], [0], [1], [0, 0, 1, 1], [], []>} : vector<16x32xf32>, vector<32x128xf32>, vector<16x128xf32> -> vector<16x128xf32>
    %49 = vector.extract_strided_slice %48 {offsets = [0, 0], sizes = [8, 128], strides = [1, 1]} : vector<16x128xf32> to vector<8x128xf32>
    %50 = vector.extract_strided_slice %48 {offsets = [8, 0], sizes = [8, 128], strides = [1, 1]} : vector<16x128xf32> to vector<8x128xf32>
    %51 = tpu.concatenate %49, %50 in 1 : vector<8x128xf32>, vector<8x128xf32> -> vector<8x256xf32>
    %52 = arith.truncf %51 : vector<8x256xf32> to vector<8x256xbf16>
    %c0_33 = arith.constant 0 : index
    %c0_34 = arith.constant 0 : index
    %53 = vector.load %arg10[%c0_33, %c0_34] : memref<256x128xbf16, #tpu.memory_space<vmem>>, vector<256x128xbf16>
    %cst_35 = arith.constant dense<0.000000e+00> : vector<8x128xf32>
    %54 = tpu.matmul %52, %53, %cst_35 {dimension_numbers = #tpu.dot_dimension_numbers<[1], [0], [0], [1], [0, 0, 1, 1], [], []>} : vector<8x256xbf16>, vector<256x128xbf16>, vector<8x128xf32> -> vector<8x128xf32>
    %c0_36 = arith.constant 0 : index
    %c0_37 = arith.constant 0 : index
    %55 = vector.load %arg11[%c0_36, %c0_37] : memref<8x8xf32, #tpu.memory_space<vmem>>, vector<8x8xf32>
    %c0_38 = arith.constant 0 : index
    %c0_39 = arith.constant 0 : index
    %56 = vector.load %arg20[%c0_38, %c0_39] : memref<8x128xf32, #tpu.memory_space<vmem>>, vector<8x128xf32>
    %cst_40 = arith.constant dense<0.000000e+00> : vector<8x128xf32>
    %57 = tpu.matmul %55, %56, %cst_40 {dimension_numbers = #tpu.dot_dimension_numbers<[1], [0], [0], [1], [0, 0, 1, 1], [], []>} : vector<8x8xf32>, vector<8x128xf32>, vector<8x128xf32> -> vector<8x128xf32>
    %c0_41 = arith.constant 0 : index
    %c0_42 = arith.constant 0 : index
    %58 = vector.load %arg12[%c0_41, %c0_42] : memref<8x1xf32, #tpu.memory_space<vmem>>, vector<8x1xf32>
    %59 = vector.broadcast %58 : vector<8x1xf32> to vector<8x128xf32>
    %60 = arith.addf %57, %59 : vector<8x128xf32>
    %61 = arith.addf %54, %60 : vector<8x128xf32>
    %cst_43 = arith.constant dense<0.000000e+00> : vector<8xf32>
    %62 = vector.multi_reduction <add>, %61, %cst_43 [1] : vector<8x128xf32> to vector<8xf32>
    %63 = vector.shape_cast %62 : vector<8xf32> to vector<8x1xf32>
    %cst_44 = arith.constant 1.280000e+02 : f32
    %64 = vector.broadcast %cst_44 : f32 to vector<8x1xf32>
    %65 = arith.divf %63, %64 : vector<8x1xf32>
    %66 = vector.broadcast %65 : vector<8x1xf32> to vector<8x128xf32>
    %67 = arith.subf %61, %66 : vector<8x128xf32>
    %68 = arith.mulf %67, %67 : vector<8x128xf32>
    %cst_45 = arith.constant dense<0.000000e+00> : vector<8xf32>
    %69 = vector.multi_reduction <add>, %68, %cst_45 [1] : vector<8x128xf32> to vector<8xf32>
    %70 = vector.shape_cast %69 : vector<8xf32> to vector<8x1xf32>
    %cst_46 = arith.constant 1.280000e+02 : f32
    %71 = vector.broadcast %cst_46 : f32 to vector<8x1xf32>
    %72 = arith.divf %70, %71 : vector<8x1xf32>
    %73 = vector.broadcast %65 : vector<8x1xf32> to vector<8x128xf32>
    %74 = arith.subf %61, %73 : vector<8x128xf32>
    %cst_47 = arith.constant 9.99999997E-7 : f32
    %75 = vector.broadcast %cst_47 : f32 to vector<8x1xf32>
    %76 = arith.addf %72, %75 : vector<8x1xf32>
    %77 = math.rsqrt %76 : vector<8x1xf32>
    %78 = vector.broadcast %77 : vector<8x1xf32> to vector<8x128xf32>
    %79 = arith.mulf %74, %78 : vector<8x128xf32>
    %c0_48 = arith.constant 0 : index
    %c0_49 = arith.constant 0 : index
    %80 = vector.load %arg13[%c0_48, %c0_49] : memref<1x128xf32, #tpu.memory_space<vmem>>, vector<1x128xf32>
    %81 = vector.broadcast %80 : vector<1x128xf32> to vector<8x128xf32>
    %82 = arith.mulf %79, %81 : vector<8x128xf32>
    %c0_50 = arith.constant 0 : index
    %c0_51 = arith.constant 0 : index
    %83 = vector.load %arg14[%c0_50, %c0_51] : memref<1x128xf32, #tpu.memory_space<vmem>>, vector<1x128xf32>
    %84 = vector.broadcast %83 : vector<1x128xf32> to vector<8x128xf32>
    %85 = arith.addf %82, %84 : vector<8x128xf32>
    %c0_52 = arith.constant 0 : index
    %c0_53 = arith.constant 0 : index
    %86 = vector.load %arg15[%c0_52, %c0_53] : memref<16x8xf32, #tpu.memory_space<vmem>>, vector<16x8xf32>
    %cst_54 = arith.constant dense<0.000000e+00> : vector<16x128xf32>
    %87 = tpu.matmul %86, %85, %cst_54 {dimension_numbers = #tpu.dot_dimension_numbers<[1], [0], [0], [1], [0, 0, 1, 1], [], []>} : vector<16x8xf32>, vector<8x128xf32>, vector<16x128xf32> -> vector<16x128xf32>
    %c0_55 = arith.constant 0 : index
    %c0_56 = arith.constant 0 : index
    %88 = vector.load %arg16[%c0_55, %c0_56] : memref<16x1xf32, #tpu.memory_space<vmem>>, vector<16x1xf32>
    %89 = vector.broadcast %88 : vector<16x1xf32> to vector<16x128xf32>
    %90 = arith.addf %87, %89 : vector<16x128xf32>
    %cst_57 = arith.constant 5.000000e-01 : f32
    %91 = vector.broadcast %cst_57 : f32 to vector<16x128xf32>
    %92 = arith.mulf %91, %90 : vector<16x128xf32>
    %cst_58 = arith.constant 0.707106769 : f32
    %93 = vector.broadcast %cst_58 : f32 to vector<16x128xf32>
    %94 = arith.mulf %90, %93 : vector<16x128xf32>
    %95 = math.erf %94 : vector<16x128xf32>
    %cst_59 = arith.constant 1.000000e+00 : f32
    %96 = vector.broadcast %cst_59 : f32 to vector<16x128xf32>
    %97 = arith.addf %96, %95 : vector<16x128xf32>
    %98 = arith.mulf %92, %97 : vector<16x128xf32>
    %c0_60 = arith.constant 0 : index
    %c0_61 = arith.constant 0 : index
    %99 = vector.load %arg17[%c0_60, %c0_61] : memref<8x16xf32, #tpu.memory_space<vmem>>, vector<8x16xf32>
    %cst_62 = arith.constant dense<0.000000e+00> : vector<8x128xf32>
    %100 = tpu.matmul %99, %98, %cst_62 {dimension_numbers = #tpu.dot_dimension_numbers<[1], [0], [0], [1], [0, 0, 1, 1], [], []>} : vector<8x16xf32>, vector<16x128xf32>, vector<8x128xf32> -> vector<8x128xf32>
    %c0_63 = arith.constant 0 : index
    %c0_64 = arith.constant 0 : index
    %101 = vector.load %arg18[%c0_63, %c0_64] : memref<8x1xf32, #tpu.memory_space<vmem>>, vector<8x1xf32>
    %102 = vector.broadcast %101 : vector<8x1xf32> to vector<8x128xf32>
    %103 = arith.addf %100, %102 : vector<8x128xf32>
    %c0_65 = arith.constant 0 : index
    %c0_66 = arith.constant 0 : index
    %c0_67 = arith.constant 0 : index
    %104 = vector.load %arg19[%c0_65, %c0_66, %c0_67] : memref<1x8x128xf32, #tpu.memory_space<vmem>>, vector<1x8x128xf32>
    %105 = vector.shape_cast %104 : vector<1x8x128xf32> to vector<8x128xf32>
    %106 = vector.shape_cast %103 : vector<8x128xf32> to vector<1x8x128xf32>
    tpu.vector_store %arg19[%c0_65, %c0_66, %c0_67], %106 {strides = array<i32>} : memref<1x8x128xf32, #tpu.memory_space<vmem>>, vector<1x8x128xf32>,
    return
  }
  func.func @transform_0(%arg0: i32) -> (i32, i32, i32) {
    %c0_i32 = arith.constant 0 : i32
    %c0_i32_0 = arith.constant 0 : i32
    %c0_i32_1 = arith.constant 0 : i32
    return %arg0, %c0_i32, %c0_i32_0 : i32, i32, i32
  }
  func.func @transform_1(%arg0: i32) -> (i32, i32) {
    %c0_i32 = arith.constant 0 : i32
    %c0_i32_0 = arith.constant 0 : i32
    %c0_i32_1 = arith.constant 0 : i32
    return %c0_i32, %c0_i32_0 : i32, i32
  }
  func.func @transform_2(%arg0: i32) -> (i32, i32) {
    %c0_i32 = arith.constant 0 : i32
    %c0_i32_0 = arith.constant 0 : i32
    %c0_i32_1 = arith.constant 0 : i32
    return %c0_i32, %c0_i32_0 : i32, i32
  }
  func.func @transform_3(%arg0: i32) -> (i32, i32) {
    %c0_i32 = arith.constant 0 : i32
    %c0_i32_0 = arith.constant 0 : i32
    %c0_i32_1 = arith.constant 0 : i32
    return %c0_i32, %c0_i32_0 : i32, i32
  }
  func.func @transform_4(%arg0: i32) -> (i32, i32) {
    %c0_i32 = arith.constant 0 : i32
    %c0_i32_0 = arith.constant 0 : i32
    %c0_i32_1 = arith.constant 0 : i32
    return %c0_i32, %c0_i32_0 : i32, i32
  }
  func.func @transform_5(%arg0: i32) -> (i32, i32) {
    %c0_i32 = arith.constant 0 : i32
    %c0_i32_0 = arith.constant 0 : i32
    %c0_i32_1 = arith.constant 0 : i32
    return %c0_i32, %c0_i32_0 : i32, i32
  }
  func.func @transform_6(%arg0: i32) -> (i32, i32) {
    %c0_i32 = arith.constant 0 : i32
    %c0_i32_0 = arith.constant 0 : i32
    %c0_i32_1 = arith.constant 0 : i32
    return %c0_i32, %c0_i32_0 : i32, i32
  }
  func.func @transform_7(%arg0: i32) -> (i32, i32) {
    %c0_i32 = arith.constant 0 : i32
    %c0_i32_0 = arith.constant 0 : i32
    %c0_i32_1 = arith.constant 0 : i32
    return %c0_i32, %c0_i32_0 : i32, i32
  }
  func.func @transform_8(%arg0: i32) -> (i32, i32) {
    %c0_i32 = arith.constant 0 : i32
    %c0_i32_0 = arith.constant 0 : i32
    %c0_i32_1 = arith.constant 0 : i32
    return %c0_i32, %c0_i32_0 : i32, i32
  }
  func.func @transform_9(%arg0: i32) -> (i32, i32) {
    %c0_i32 = arith.constant 0 : i32
    %c0_i32_0 = arith.constant 0 : i32
    %c0_i32_1 = arith.constant 0 : i32
    return %c0_i32, %c0_i32_0 : i32, i32
  }
  func.func @transform_10(%arg0: i32) -> (i32, i32) {
    %c0_i32 = arith.constant 0 : i32
    %c0_i32_0 = arith.constant 0 : i32
    %c0_i32_1 = arith.constant 0 : i32
    return %c0_i32, %c0_i32_0 : i32, i32
  }
  func.func @transform_11(%arg0: i32) -> (i32, i32) {
    %c0_i32 = arith.constant 0 : i32
    %c0_i32_0 = arith.constant 0 : i32
    %c0_i32_1 = arith.constant 0 : i32
    return %c0_i32, %c0_i32_0 : i32, i32
  }
  func.func @transform_12(%arg0: i32) -> (i32, i32) {
    %c0_i32 = arith.constant 0 : i32
    %c0_i32_0 = arith.constant 0 : i32
    %c0_i32_1 = arith.constant 0 : i32
    return %c0_i32, %c0_i32_0 : i32, i32
  }
  func.func @transform_13(%arg0: i32) -> (i32, i32) {
    %c0_i32 = arith.constant 0 : i32
    %c0_i32_0 = arith.constant 0 : i32
    %c0_i32_1 = arith.constant 0 : i32
    return %c0_i32, %c0_i32_0 : i32, i32
  }
  func.func @transform_14(%arg0: i32) -> (i32, i32) {
    %c0_i32 = arith.constant 0 : i32
    %c0_i32_0 = arith.constant 0 : i32
    %c0_i32_1 = arith.constant 0 : i32
    return %c0_i32, %c0_i32_0 : i32, i32
  }
  func.func @transform_15(%arg0: i32) -> (i32, i32) {
    %c0_i32 = arith.constant 0 : i32
    %c0_i32_0 = arith.constant 0 : i32
    %c0_i32_1 = arith.constant 0 : i32
    return %c0_i32, %c0_i32_0 : i32, i32
  }
  func.func @transform_16(%arg0: i32) -> (i32, i32) {
    %c0_i32 = arith.constant 0 : i32
    %c0_i32_0 = arith.constant 0 : i32
    %c0_i32_1 = arith.constant 0 : i32
    return %c0_i32, %c0_i32_0 : i32, i32
  }
  func.func @transform_17(%arg0: i32) -> (i32, i32) {
    %c0_i32 = arith.constant 0 : i32
    %c0_i32_0 = arith.constant 0 : i32
    %c0_i32_1 = arith.constant 0 : i32
    return %c0_i32, %c0_i32_0 : i32, i32
  }
  func.func @transform_18(%arg0: i32) -> (i32, i32, i32) {
    %c0_i32 = arith.constant 0 : i32
    %c0_i32_0 = arith.constant 0 : i32
    %c0_i32_1 = arith.constant 0 : i32
    return %arg0, %c0_i32, %c0_i32_0 : i32, i32, i32
  }
}

</mosaic_0001>

<bundles_post_ra>
// kernel: tpu_custom_call.1
= control target key start
LH: loop header
LB: loop body
LE: loop exit
PB: predicated region body
PF: predicated region fallthrough
CT: control target
= control target key end

     0   :  { %s3219_s0 = inlined_call_operand.hbm [shape: f32[2,8,128], index: 0, kind: input, shape index: {}]   ;;  %s3220_s1 = inlined_call_operand.hbm [shape: f32[1,128], index: 1, kind: input, shape index: {}]   ;;  %s3221_s2 = inlined_call_operand.hbm [shape: f32[1,128], index: 2, kind: input, shape index: {}]   ;;  %s3222_s3 = inlined_call_operand.vmem [shape: bf16[128,256], index: 3, kind: input, shape index: {}]   ;;  %s3223_s4 = inlined_call_operand.vmem [shape: f32[32,8], index: 4, kind: input, shape index: {}]   ;;  %s3224_s5 = inlined_call_operand.vmem [shape: f32[32,8], index: 5, kind: input, shape index: {}]   ;;  %s3225_s6 = inlined_call_operand.vmem [shape: f32[32,32], index: 6, kind: input, shape index: {}]   ;;  %s3226_s7 = inlined_call_operand.hbm [shape: f32[32,32], index: 7, kind: input, shape index: {}]   ;;  %s3227_s8 = inlined_call_operand.hbm [shape: f32[16,32], index: 8, kind: input, shape index: {}]   ;;  %s3228_s9 = inlined_call_operand.hbm [shape: bf16[256,128], index: 9, kind: input, shape index: {}]   ;;  %s3229_s10 = inlined_call_operand.vmem [shape: f32[8,8], index: 10, kind: input, shape index: {}]   ;;  %s3230_s11 = inlined_call_operand.vmem [shape: f32[8,1], index: 11, kind: input, shape index: {}]   ;;  %s3231_s12 = inlined_call_operand.hbm [shape: f32[1,128], index: 12, kind: input, shape index: {}]   ;;  %s3232_s13 = inlined_call_operand.vmem [shape: f32[1,128], index: 13, kind: input, shape index: {}]   ;;  %s3233_s14 = inlined_call_operand.vmem [shape: f32[16,8], index: 14, kind: input, shape index: {}]   ;;  %s3234_s15 = inlined_call_operand.vmem [shape: f32[16,1], index: 15, kind: input, shape index: {}]   ;;  %s3235_s16 = inlined_call_operand.vmem [shape: f32[8,16], index: 16, kind: input, shape index: {}]   ;;  %s3236_s17 = inlined_call_operand.vmem [shape: f32[8,1], index: 17, kind: input, shape index: {}]   ;;  %s3237_s18 = inlined_call_operand.hbm [shape: f32[2,8,128], index: 18, kind: output, shape index: {}]  }
   0x1   :  { %3252 = sst [smem:[#allocation21_spill]] %s3219_s0 }
   0x2   :  { %3253 = sst [smem:[#allocation22_spill]] %s3220_s1 }
   0x3   :  { %3254 = sst [smem:[#allocation23_spill]] %s3221_s2 }
   0x4   :  { %3255 = sst [smem:[#allocation24_spill]] %s3225_s6 }
   0x5   :  { %3256 = sst [smem:[#allocation25_spill]] %s3226_s7 }
   0x6   :  { %3257 = sst [smem:[#allocation26_spill]] %s3229_s10 }
   0x7   :  { %3258 = sst [smem:[#allocation27_spill]] %s3230_s11 }
   0x8   :  { %3259 = sst [smem:[#allocation28_spill]] %s3232_s13 }
   0x9   :  { %3260 = sst [smem:[#allocation29_spill]] %s3233_s14 }
   0xa   :  { %3261 = sst [smem:[#allocation30_spill]] %s3234_s15 }
   0xb   :  { %3262 = sst [smem:[#allocation31_spill]] %s3235_s16 }
   0xc   :  { %3263 = sst [smem:[#allocation32_spill]] %s3236_s17 }
   0xd   :  { %3264 = sst [smem:[#allocation33_spill]] %s3237_s18 }
   0xe   :  { %23 = vsyncpa [#allocation4], 0 }
   0xf   :  { %25 = vsyncpa [#allocation4 + $0x1], 0 }
  0x10   :  { %26 = vsyncpa [#allocation7], 0 }
  0x11   :  { %27 = vsyncpa [#allocation10], 0 }
  0x12   :  { %28 = vsyncpa [#allocation13], 0 }
  0x13   :  { %29 = vsyncpa [#allocation5], 0 }
  0x14   :  { %31 = vsyncpa [#allocation5 + $0x1], 0  ;;  %s2749_s27 = smov 0   ;;  %s2751_s28 = smov 0  }
  0x15   :  { %s2753_s29 = smov 0   ;;  %s2755_s30 = smov 0  }
  0x16 LB: > { %s2638_s0 = smov [#allocation6]   ;;  %s2770_s1 = sadd.s32 4294967295, %s2636_s30   ;;  %s2636_s30 = sphi %s2755_s30, %s3302_s30   ;;  %s2632_s29 = sphi %s2753_s29, %s3301_s29   ;;  %s2628_s28 = sphi %s2751_s28, %s3300_s28   ;;  %s2624_s27 = sphi %s2749_s27, %s3299_s27  }
  0x17   : > { %s464_s19 = sshll.u32 %s2638_s0, 4  ;;  %p1949_p0 = scmp.ge.s32.totalorder %s2636_s30, 1  ;;  %s2775_s19 = int_to_ptr.vmem [resolvable:$true] %s464_s19 }
  0x18   : > { %p3248_p1 = scmp.eq.s32.totalorder %s2770_s1, 0  ;;  %p451_p2 = scmp.lt.s32.totalorder %s2636_s30, 3 }
  0x19   : > { %s2639_s21 = smov [#allocation9]   ;;  %s2640_s23 = smov [#allocation12]  }
  0x1a   : > { %p2777_p3 = pnand %p1949_p0, %p451_p2  ;;  %s497_s22 = sshll.u32 %s2639_s21, 4  ;;  %s2784_s22 = int_to_ptr.vmem [resolvable:$true] %s497_s22 }
  0x1b   : > { %s523_s24 = sshll.u32 %s2640_s23, 4  ;;  %s3267_s0 = sld [smem:[#allocation22_spill]]  ;;  %s2792_s24 = int_to_ptr.vmem [resolvable:$true] %s523_s24 }
  0x1c   : > { %s3265_s20 = scalar_select %p2777_p3, 1, 0 }
  0x1d   : > { %p2223_p5 = pneg %p2777_p3 }
  0x1f   : > { %p2788_p6 = pnand %p2223_p5, %p3248_p1 }
  0x21   : > { %s2360_s18 = scalar_lea.hbm %s3267_s0, 16  ;;  %p2802_p8 = pneg %p2788_p6 }
  0x22   : > { %p2361_p7 = scmp.ne.s32.totalorder %s3267_s0, %s2360_s18  ;;  %p2367_p11 = scmp.lt.u32.totalorder %s2360_s18, %s3267_s0 }
  0x24   : > { %p2363_p9 = pnand %p2802_p8, %p2361_p7 }
  0x26   : > { %p2364_p10 = pneg %p2363_p9 }
  0x28   : > { %p2369_p12 = pnand %p2367_p11, %p2364_p10 }
  0x2a   : > { %2372 = shalt.err (!%p2369_p12)
}
  0x2b   : > { %s2373_s13 = scalar_lea.vmem %s2775_s19, 16  ;;  %s2380_s16 = scalar_lea.vmem %s2775_s19, 32 }
  0x2c   : > { %p2374_p13 = scmp.ne.s32.totalorder %s2775_s19, %s2373_s13  ;;  %p2381_p5 = scmp.lt.s32.totalorder %s2775_s19, %s2775_s19 }
  0x2d   : > { %p2382_p7 = scmp.lt.s32.totalorder %s2380_s16, %s2373_s13 }
  0x2e   : > { %p2376_p0 = pnand %p2374_p13, %p2802_p8 }
  0x2f   : > { %p2383_p9 = por %p2382_p7, %p2381_p5 }
  0x30   : > { %p2377_p2 = pneg %p2376_p0 }
  0x32   : > { %p2384_p4 = pnand %p2383_p9, %p2377_p2 }
  0x34   : > { %2387 = shalt.err (!%p2384_p4)
}
  0x35   : > { %2226 = dma.hbm_to_vmem [thread:$0]  (!%p2788_p6), %s3267_s0, 16, %s2775_s19, [#allocation7]  }
  0x36   : > { %s3269_s7 = sld [smem:[#allocation25_spill]] }
  0x3c   : > { %s2388_s23 = scalar_lea.hbm %s3269_s7, 512 }
  0x3d   : > { %p2389_p10 = scmp.ne.s32.totalorder %s3269_s7, %s2388_s23  ;;  %p2395_p4 = scmp.lt.u32.totalorder %s2388_s23, %s3269_s7 }
  0x3f   : > { %p2391_p11 = pnand %p2389_p10, %p2802_p8 }
  0x41   : > { %p2392_p12 = pneg %p2391_p11 }
  0x43   : > { %p2397_p13 = pnand %p2395_p4, %p2392_p12 }
  0x45   : > { %2400 = shalt.err (!%p2397_p13)
}
  0x46   : > { %s2401_s19 = scalar_lea.vmem %s2784_s22, 512  ;;  %p2409_p7 = scmp.lt.s32.totalorder %s2784_s22, %s2784_s22 }
  0x47   : > { %p2402_p0 = scmp.ne.s32.totalorder %s2784_s22, %s2401_s19  ;;  %p2410_p9 = scmp.lt.s32.totalorder %s2401_s19, %s2401_s19 }
  0x49   : > { %p2404_p2 = pnand %p2402_p0, %p2802_p8  ;;  %p2411_p10 = por %p2410_p9, %p2409_p7 }
  0x4b   : > { %p2405_p5 = pneg %p2404_p2 }
  0x4d   : > { %p2412_p11 = pnand %p2411_p10, %p2405_p5 }
  0x4f   : > { %2415 = shalt.err (!%p2412_p11)
}
  0x50   : > { %s3245_s14 = smov 128   ;;  %s3246_s15 = smov 8  }
  0x51   : > { %2232 = dma.hbm_to_vmem [thread:$0]  (!%p2788_p6), %s3269_s7, 512, %s2784_s22, [#allocation10], %s3245_s14, %s3245_s14, %s3246_s15  }
  0x52   : > { %s2416_s23 = scalar_lea.hbm %s3228_s9, 2048 }
  0x53   : > { %p2417_p12 = scmp.ne.s32.totalorder %s3228_s9, %s2416_s23  ;;  %p2423_p0 = scmp.lt.u32.totalorder %s2416_s23, %s3228_s9 }
  0x55   : > { %p2419_p4 = pnand %p2417_p12, %p2802_p8 }
  0x57   : > { %p2420_p13 = pneg %p2419_p4 }
  0x59   : > { %p2425_p2 = pnand %p2423_p0, %p2420_p13 }
  0x5b   : > { %2428 = shalt.err (!%p2425_p2)
}
  0x5c   : > { %s2429_s22 = scalar_lea.vmem %s2792_s24, 2048  ;;  %p2437_p10 = scmp.lt.s32.totalorder %s2792_s24, %s2792_s24 }
  0x5d   : > { %p2430_p5 = scmp.ne.s32.totalorder %s2792_s24, %s2429_s22  ;;  %p2438_p11 = scmp.lt.s32.totalorder %s2429_s22, %s2429_s22 }
  0x5f   : > { %p2432_p7 = pnand %p2430_p5, %p2802_p8  ;;  %p2439_p12 = por %p2438_p11, %p2437_p10 }
  0x61   : > { %p2433_p9 = pneg %p2432_p7 }
  0x63   : > { %p2440_p4 = pnand %p2439_p12, %p2433_p9 }
  0x65   : > { %2443 = shalt.err (!%p2440_p4)
}
  0x66   : > { %s2643_s17 = smov 64   ;;  %s2644_s0 = smov 4  }
  0x67   : > { %2238 = dma.hbm_to_vmem [thread:$0]  (!%p2788_p6), %s3228_s9, 2048, %s2792_s24, [#allocation13], %s2643_s17, %s2643_s17, %s2644_s0  }
  0x68   : > { %s2645_s26 = smov [#allocation8]   ;;  %s2646_s13 = smov [#allocation11]  }
  0x69   : > { %s475_s23 = sshll.u32 %s2645_s26, 4  ;;  %s510_s16 = sshll.u32 %s2646_s13, 4  ;;  %s476_s23 = int_to_ptr.vmem [resolvable:$true] %s475_s23  ;;  %s511_s16 = int_to_ptr.vmem [resolvable:$true] %s510_s16 }
  0x6a   : > { %s3270_s14 = sld [smem:[#allocation23_spill]] }
  0x70   : > { %s2444_s15 = scalar_lea.hbm %s3270_s14, 16 }
  0x71   : > { %p2445_p13 = scmp.ne.s32.totalorder %s3270_s14, %s2444_s15  ;;  %p2451_p5 = scmp.lt.u32.totalorder %s2444_s15, %s3270_s14 }
  0x73   : > { %p2447_p0 = pnand %p2445_p13, %p2802_p8 }
  0x75   : > { %p2448_p2 = pneg %p2447_p0 }
  0x77   : > { %p2453_p7 = pnand %p2451_p5, %p2448_p2 }
  0x79   : > { %2456 = shalt.err (!%p2453_p7)
}
  0x7a   : > { %s2457_s24 = scalar_lea.vmem %s476_s23, 16  ;;  %s2464_s17 = scalar_lea.vmem %s476_s23, 32 }
  0x7b   : > { %p2458_p9 = scmp.ne.s32.totalorder %s476_s23, %s2457_s24  ;;  %p2465_p12 = scmp.lt.s32.totalorder %s476_s23, %s476_s23 }
  0x7c   : > { %p2466_p4 = scmp.lt.s32.totalorder %s2464_s17, %s2457_s24 }
  0x7d   : > { %p2460_p10 = pnand %p2458_p9, %p2802_p8 }
  0x7e   : > { %p2467_p1 = por %p2466_p4, %p2465_p12 }
  0x7f   : > { %p2461_p11 = pneg %p2460_p10 }
  0x81   : > { %p2468_p3 = pnand %p2467_p1, %p2461_p11 }
  0x83   : > { %2471 = shalt.err (!%p2468_p3)
}
  0x84   : > { %2229 = dma.hbm_to_vmem [thread:$0]  (!%p2788_p6), %s3270_s14, 16, %s476_s23, [#allocation7]  }
  0x85   : > { %s2472_s15 = scalar_lea.hbm %s3227_s8, 256 }
  0x86   : > { %p2473_p13 = scmp.ne.s32.totalorder %s3227_s8, %s2472_s15  ;;  %p2479_p3 = scmp.lt.u32.totalorder %s2472_s15, %s3227_s8 }
  0x88   : > { %p2475_p0 = pnand %p2473_p13, %p2802_p8 }
  0x8a   : > { %p2476_p1 = pneg %p2475_p0 }
  0x8c   : > { %p2481_p2 = pnand %p2479_p3, %p2476_p1 }
  0x8e   : > { %2484 = shalt.err (!%p2481_p2)
}
  0x8f   : > { %s2485_s13 = scalar_lea.vmem %s511_s16, 256  ;;  %p2493_p10 = scmp.lt.s32.totalorder %s511_s16, %s511_s16 }
  0x90   : > { %p2486_p5 = scmp.ne.s32.totalorder %s511_s16, %s2485_s13  ;;  %p2494_p11 = scmp.lt.s32.totalorder %s2485_s13, %s2485_s13 }
  0x92   : > { %p2488_p7 = pnand %p2486_p5, %p2802_p8  ;;  %p2495_p12 = por %p2494_p11, %p2493_p10 }
  0x94   : > { %p2489_p9 = pneg %p2488_p7 }
  0x96   : > { %p2496_p4 = pnand %p2495_p12, %p2489_p9 }
  0x98   : > { %2499 = shalt.err (!%p2496_p4)
}
  0x99   : > { %s3271_s23 = smov 8   ;;  %s3272_s19 = smov 128  }
  0x9a   : > { %2235 = dma.hbm_to_vmem [thread:$0]  (!%p2788_p6), %s3227_s8, 256, %s511_s16, [#allocation10], %s3272_s19, %s3272_s19, %s3271_s23  }
  0x9b   : > { %s2647_s17 = smov [#allocation14]   ;;  %s2500_s10 = scalar_lea.hbm %s3231_s12, 16 }
  0x9c   : > { %s543_s7 = sshll.u32 %s2647_s17, 4  ;;  %p2501_p13 = scmp.ne.s32.totalorder %s3231_s12, %s2500_s10  ;;  %s544_s7 = int_to_ptr.vmem [resolvable:$true] %s543_s7 }
  0x9d   : > { %p2507_p3 = scmp.lt.u32.totalorder %s2500_s10, %s3231_s12 }
  0x9e   : > { %p2503_p0 = pnand %p2501_p13, %p2802_p8 }
  0xa0   : > { %p2504_p1 = pneg %p2503_p0 }
  0xa2   : > { %p2509_p2 = pnand %p2507_p3, %p2504_p1 }
  0xa4   : > { %2512 = shalt.err (!%p2509_p2)
}
  0xa5   : > { %s2513_s16 = scalar_lea.vmem %s544_s7, 16  ;;  %s2520_s26 = scalar_lea.vmem %s544_s7, 32 }
  0xa6   : > { %p2514_p5 = scmp.ne.s32.totalorder %s544_s7, %s2513_s16  ;;  %p2521_p10 = scmp.lt.s32.totalorder %s544_s7, %s544_s7 }
  0xa7   : > { %p2522_p11 = scmp.lt.s32.totalorder %s2520_s26, %s2513_s16 }
  0xa8   : > { %p2516_p7 = pnand %p2514_p5, %p2802_p8 }
  0xa9   : > { %p2523_p12 = por %p2522_p11, %p2521_p10 }
  0xaa   : > { %p2517_p9 = pneg %p2516_p7 }
  0xac   : > { %p2524_p4 = pnand %p2523_p12, %p2517_p9 }
  0xae   : > { %2527 = shalt.err (!%p2524_p4)
}
  0xaf   : > { %2241 = dma.hbm_to_vmem [thread:$0]  (!%p2788_p6), %s3231_s12, 16, %s544_s7, [#allocation13]  }
  0xb0   : > { %s1948_s21 = sadd.s32 4294967294, %s2636_s30   ;;  %s2932_s2 = sadd.s32 1, %s2636_s30  }
  0xb1   : > { %s41_s19 = ssub.s32 %s2636_s30, %s2932_s2  ;;  %s44_s22 = sadd.s32 1, %s2632_s29 }
  0xb2   : > { %p42_p8 = scmp.eq.s32.totalorder %s41_s19, 0  ;;  %p51_p13 = scmp.ne.s32.totalorder %s2632_s29, %s2628_s28 }
  0xb3   : > { %p52_p0 = scmp.eq.s32.totalorder %s2636_s30, 0  ;;  %p57_p1 = scmp.ne.s32.totalorder %s2628_s28, %s2624_s27 }
  0xb4   : > { %s2943_s24 = scalar_select %p42_p8, %s2632_s29, %s44_s22  }
  0xb5   : > { %p2945_p3 = por %p52_p0, %p51_p13  ;;  %p3274_p2 = scmp.eq.s32.totalorder %s2770_s1, 0 }
  0xb6   : > { %p438_p5 = scmp.eq.s32.totalorder %s2770_s1, 1  ;;  %p444_p7 = scmp.eq.s32.totalorder %s1948_s21, 1 }
  0xb7   : > { %p2951_p6 = por %p3274_p2, %p57_p1  ;;  %p2256_p9 = scmp.lt.s32.totalorder %s2636_s30, 2 }
  0xb8   : > { %s569_s11 = sand.u32 1, %s2632_s29   ;;  %p2958_p10 = por %p438_p5, %p51_p13 }
  0xb9   : > { %p2962_p11 = por %p444_p7, %p57_p1  ;;  %s1957_s15 = sshll.u32 %s569_s11, 3 }
  0xba   : > { %s3276_s6 = scalar_select %p2958_p10, 1, 0 }
  0xbb   : > { %s3277_s10 = scalar_select %p2962_p11, 1, 0 }
  0xbc   : > { %s1958_s0 = sshll.u32 %s2636_s30, 7  ;;  %s3278_s16 = sld [smem:[#allocation21_spill]] }
  0xbd   : > { %s573_s13 = scalar_lea.vmem [#allocation3], %s1957_s15  ;;  %p2976_p12 = pnand %p2256_p9, %p2945_p3 }
  0xbe   : > { %s580_s23 = sshll.u32 %s573_s13, 4  ;;  %s570_s19 = scalar_lea.sflag [#allocation4], %s569_s11  ;;  %s2972_s23 = int_to_ptr.vmem [resolvable:$true] %s580_s23 }
  0xbf   : > { %p2530_p8 = pneg %p2976_p12 }
  0xc2   : > { %s2970_s26 = scalar_lea.hbm %s3278_s16, %s1958_s0  ;;  %s2533_s18 = scalar_lea.hbm %s3278_s16, 256 }
  0xc3   : > { %s2528_s22 = scalar_lea.hbm %s2970_s26, 128  ;;  %p2534_p1 = scmp.lt.u32.totalorder %s2970_s26, %s3278_s16 }
  0xc4   : > { %p2529_p4 = scmp.ne.s32.totalorder %s2970_s26, %s2528_s22  ;;  %p2535_p3 = scmp.lt.u32.totalorder %s2533_s18, %s2528_s22 }
  0xc5   : > { %p2537_p5 = scmp.lt.u32.totalorder %s2528_s22, %s2970_s26 }
  0xc6   : > { %p2531_p13 = pnand %p2530_p8, %p2529_p4  ;;  %p2536_p2 = por %p2535_p3, %p2534_p1 }
  0xc8   : > { %p2532_p0 = pneg %p2531_p13  ;;  %p2538_p7 = por %p2537_p5, %p2536_p2 }
  0xca   : > { %p2539_p9 = pnand %p2538_p7, %p2532_p0 }
  0xcc   : > { %2542 = shalt.err (!%p2539_p9)
}
  0xcd   : > { %s2543_s11 = scalar_lea.vmem %s2972_s23, 128  ;;  %s2648_s13 = smov [#allocation3]  }
  0xce   : > { %p2544_p4 = scmp.ne.s32.totalorder %s2972_s23, %s2543_s11  ;;  %s2548_s15 = sshll.u32 %s2648_s13, 4  ;;  %s2549_s15 = int_to_ptr.vmem [resolvable:$false] %s2548_s15 }
  0xcf   : > { %s2550_s0 = scalar_lea.vmem %s2549_s15, 256  ;;  %p2551_p10 = scmp.lt.s32.totalorder %s2972_s23, %s2549_s15 }
  0xd0   : > { %p2546_p13 = pnand %p2544_p4, %p2530_p8  ;;  %p2552_p1 = scmp.lt.s32.totalorder %s2550_s0, %s2543_s11 }
  0xd2   : > { %p2547_p11 = pneg %p2546_p13  ;;  %p2553_p3 = por %p2552_p1, %p2551_p10 }
  0xd4   : > { %p2554_p2 = pnand %p2553_p3, %p2547_p11 }
  0xd6   : > { %2557 = shalt.err (!%p2554_p2)
}
  0xd7   : > { %2245 = dma.hbm_to_vmem [thread:$0]  (!%p2976_p12), %s2970_s26, 128, %s2972_s23, %s570_s19  }
  0xd8   : > { %p3280_p0 = scmp.ne.s32.totalorder %s3265_s20, 0 }
  0xd9   : > { %s3008_s22 = sand.u32 (!%p3280_p0), 1, %s2628_s28  }
  0xda   : > { %589 = sbr.rel (%p3280_p0) target bundleno = 2658 (0xa62), region = 92  ;;  %s1960_s18 = sshll.u32 (!%p3280_p0), %s3008_s22, 3 }
  0xdb   : > { %s592_s17 = scalar_lea.sflag (!%p3280_p0), [#allocation4], %s3008_s22  ;;  %s595_s25 = scalar_lea.vmem (!%p3280_p0), [#allocation3], %s1960_s18 }
  0xe1   : > { %2603 = dma.done.wait (%p2951_p6), %s592_s17, 128  }
  0xe2   : > { %2605 = vsyncadd (%p2951_p6), %s592_s17, 4294967168  ;;  %p3281_p10 = scmp.eq.s32.totalorder %s2770_s1, 0 }
  0xe4   : > { %2607 = dma.done.wait (%p3281_p10), [#allocation7], 32   ;;  %p3282_p11 = pmov %p3281_p10 }
  0xe5   : > { %p3283_p12 = pmov %p3281_p10 }
  0xe6   : > { %2609 = vsyncadd (%p3282_p11), [#allocation7], 4294967264 }
  0xe7   : > { %2611 = dma.done.wait (%p3283_p12), [#allocation10], 768   ;;  %p3284_p8 = pmov %p3281_p10 }
  0xe9   : > { %2613 = vsyncadd (%p3284_p8), [#allocation10], 4294966528  ;;  %p3285_p5 = pmov %p3284_p8 }
  0xeb   : > { %2615 = dma.done.wait (%p3285_p5), [#allocation13], 2064   ;;  %p3286_p7 = pmov %p3285_p5 }
  0xec   : > { %v673_v0 = vld [vmem:[%s595_s25] sm:$0xff]  ;;  %v2315_v3 = vld [vmem:[%s3222_s3 + $0x14] ss:$8 sps:$4 sm:$0xff]   ;;  %v2317_v4 = vld [vmem:[%s3222_s3 + $0x10] ss:$8 sps:$4 sm:$0xff]   ;;  %v2649_v16 = vmov 0  }
  0xed   : > { %2617 = vsyncadd (%p3286_p7), [#allocation13], 4294965232  ;;  %674 = vadd.xlane.f32.xlu0 %v673_v0  ;;  %v2312_v1 = vld [vmem:[%s3222_s3 + $0x4] ss:$8 sps:$4 sm:$0xff]   ;;  %v2314_v2 = vld [vmem:[%s3222_s3] ss:$8 sps:$4 sm:$0xff]   ;;  %832 = vmatprep.mubr.bf16.mxu0 %v2649_v16 }
  0xee   : > { %800 = vmatprep.subr.bf16.mxu0 %v2312_v1  ;;  %v2318_v5 = vld [vmem:[%s3222_s3 + $0x24] ss:$8 sps:$4 sm:$0xff]   ;;  %v2320_v10 = vld [vmem:[%s3222_s3 + $0x20] ss:$8 sps:$4 sm:$0xff]   ;;  %v2321_v11 = vld [vmem:[%s3222_s3 + $0x34] ss:$8 sps:$4 sm:$0xff]   ;;  %2310 = vset.pattern.permute.xlu1 %v2649_v16 }
  0xef   : > { %801 = vmatpush1.bf16.msra.mxu0 %v2314_v2  ;;  %v2323_v12 = vld [vmem:[%s3222_s3 + $0x30] ss:$8 sps:$4 sm:$0xff]   ;;  %v2324_v13 = vld [vmem:[%s3222_s3 + $0x44] ss:$8 sps:$4 sm:$0xff]   ;;  %v2326_v14 = vld [vmem:[%s3222_s3 + $0x40] ss:$8 sps:$4 sm:$0xff]   ;;  %2311 = vset.pattern.permute.xlu0 %v2649_v16 }
  0xf0   : > { %802 = vmatprep.subr.bf16.mxu0 %v2315_v3  ;;  %v2327_v15 = vld [vmem:[%s3222_s3 + $0x54] ss:$8 sps:$4 sm:$0xff]   ;;  %v2329_v17 = vld [vmem:[%s3222_s3 + $0x50] ss:$8 sps:$4 sm:$0xff]   ;;  %v2330_v18 = vld [vmem:[%s3222_s3 + $0x64] ss:$8 sps:$4 sm:$0xff]  }
  0xf1   : > { %v2332_v19 = vld [vmem:[%s3222_s3 + $0x60] ss:$8 sps:$4 sm:$0xff]   ;;  %v2333_v20 = vld [vmem:[%s3222_s3 + $0x74] ss:$8 sps:$4 sm:$0xff]   ;;  %v2335_v21 = vld [vmem:[%s3222_s3 + $0x70] ss:$8 sps:$4 sm:$0xff]  }
  0xf2   : > { %v1968_v26 = vld [vmem:[#allocation6] ss:$0 sm:$0xff]  ;;  %v1969_v28 = vld [vmem:[#allocation8] ss:$0 sm:$0xff]  ;;  %v845_v32 = vld [vmem:[%s3224_s5] sm:$0xff]  ;;  %vm849_vm0 = vcmask 64512  }
  0xf3   : > { %803 = vmatpush1.bf16.msra.mxu0 %v2317_v4  ;;  %2094 = vmatprep.mubr.msk.f32.mxu1 %vm849_vm0, %v845_v32  ;;  %v846_v35 = vld [vmem:[%s3224_s5 + $0x8] sm:$0xff]  ;;  %v847_v37 = vld [vmem:[%s3224_s5 + $0x10] sm:$0xff]  ;;  %v848_v39 = vld [vmem:[%s3224_s5 + $0x18] sm:$0xff]  ;;  %s3287_s26 = sld [smem:[#allocation24_spill]]  ;;  %vm1052_vm1 = vcmask 261120   ;;  %vm2651_vm2 = vmmov 0  }
  0xf4   : > { %804 = vmatprep.subr.bf16.mxu0 %v2318_v5  ;;  %v841_v40 = vld [vmem:[%s3223_s4] sm:$0xff]  ;;  %v842_v41 = vld [vmem:[%s3223_s4 + $0x8] sm:$0xff]  ;;  %v843_v42 = vld [vmem:[%s3223_s4 + $0x10] sm:$0xff]  ;;  %s3288_s25 = sld [smem:[#allocation26_spill]]  ;;  %s3289_s23 = sld [smem:[#allocation27_spill]]  ;;  %vm1732_vm3 = vcmask 130048  }
  0xf5   : > { %v844_v43 = vld [vmem:[%s3223_s4 + $0x18] sm:$0xff]  ;;  %s3290_s11 = sld [smem:[#allocation30_spill]]  ;;  %s3291_s0 = sld [smem:[#allocation29_spill]] }
  0xf6   : > { %v1154_v58 = vld [vmem:[#allocation9] sm:$0xff]  ;;  %v1155_v5 = vld [vmem:[#allocation9 + $0x8] sm:$0xff]  ;;  %s3293_s13 = sld [smem:[#allocation28_spill]]  ;;  %s3294_s7 = sld [smem:[#allocation31_spill]] }
  0xf7   : > { %805 = vmatpush1.bf16.msra.mxu0 %v2320_v10  ;;  %v2337_v10 = vld [vmem:[#allocation12] sm:$0xff]   ;;  %v2343_v16 = vld [vmem:[#allocation12 + $0x18] sm:$0xff]   ;;  %s671_s21 = scalar_lea.vmem [#allocation15], %s1960_s18  ;;  %s3295_s17 = sld [smem:[#allocation33_spill]] }
  0xf8   : > { %806 = vmatprep.subr.bf16.mxu0 %v2321_v11  ;;  %v2338_v11 = vld [vmem:[#allocation12 + $0x48] sm:$0xff]   ;;  %s1821_s19 = sshll.u32 %s671_s21, 4  ;;  %p3296_p9 = scmp.ne.s32.totalorder %s3276_s6, 0  ;;  %s3177_s19 = int_to_ptr.vmem [resolvable:$true] %s1821_s19 }
  0xf9   : > { %v1048_v44 = vld [vmem:[%s3287_s26] sm:$0xff]  ;;  %v1049_v55 = vld [vmem:[%s3287_s26 + $0x8] sm:$0xff]  ;;  %v1050_v56 = vld [vmem:[%s3287_s26 + $0x10] sm:$0xff]  ;;  %s2653_s18 = smov [#allocation15]  }
  0xfa   : > { %v1051_v57 = vld [vmem:[%s3287_s26 + $0x18] sm:$0xff]  ;;  %s2562_s20 = sshll.u32 %s2653_s18, 4  ;;  %s2563_s20 = int_to_ptr.vmem [resolvable:$false] %s2562_s20 }
  0xfb   : > { %807 = vmatpush1.bf16.msra.mxu0 %v2323_v12  ;;  %v2339_v12 = vld [vmem:[#allocation12 + $0x8] sm:$0xff]   ;;  %p2565_p1 = scmp.lt.s32.totalorder %s3177_s19, %s2563_s20 }
  0xfc   : > { %808 = vmatprep.subr.bf16.mxu0 %v2324_v13  ;;  %v2340_v13 = vld [vmem:[#allocation12 + $0x50] sm:$0xff]  }
  0xff   : > { %809 = vmatpush1.bf16.msra.mxu0 %v2326_v14  ;;  %v2341_v14 = vld [vmem:[#allocation12 + $0x10] sm:$0xff]  }
 0x100   : > { %810 = vmatprep.subr.bf16.mxu0 %v2327_v15  ;;  %v2342_v15 = vld [vmem:[#allocation12 + $0x58] sm:$0xff]  }
 0x103   : > { %811 = vmatpush1.bf16.msra.mxu0 %v2329_v17  ;;  %v2344_v17 = vld [vmem:[#allocation12 + $0x60] sm:$0xff]  }
 0x104   : > { %812 = vmatprep.subr.bf16.mxu0 %v2330_v18  ;;  %v2345_v18 = vld [vmem:[#allocation12 + $0x20] sm:$0xff]  }
 0x107   : > { %813 = vmatpush1.bf16.msra.mxu0 %v2332_v19  ;;  %v2346_v19 = vld [vmem:[#allocation12 + $0x68] sm:$0xff]  }
 0x108   : > { %814 = vmatprep.subr.bf16.mxu0 %v2333_v20  ;;  %v2347_v20 = vld [vmem:[#allocation12 + $0x28] sm:$0xff]  }
 0x10b   : > { %815 = vmatpush1.bf16.msra.mxu0 %v2335_v21  ;;  %v2348_v21 = vld [vmem:[#allocation12 + $0x70] sm:$0xff]  }
 0x17a   : > { %v675_v6 = vpop.xlane.xlu0 %674 }
 0x17b   : > { %v677_v7 = vmul.f32 0.0078125, %v675_v6  ;;  %v1156_v6 = vld [vmem:[#allocation9 + $0x10] sm:$0xff] }
 0x17d   : > { %v678_v8 = vsub.f32 %v673_v0, %v677_v7  ;;  %v1157_v7 = vld [vmem:[#allocation9 + $0x18] sm:$0xff] }
 0x17f   : > { %v679_v9 = vmul.f32 %v678_v8, %v678_v8 }
 0x181   : > { %680 = vadd.xlane.f32.xlu0 %v679_v9  ;;  %v2336_v9 = vld [vmem:[#allocation12 + $0x40] sm:$0xff]  }
 0x182   : > { %2064 = vmatprep.subr.bf16.mxu0 %v2336_v9 }
 0x20e   : > { %v681_v22 = vpop.xlane.xlu0 %680 }
 0x20f   : > { %v682_v23 = vmul.f32 0.0078125, %v681_v22  ;;  %v2349_v22 = vld [vmem:[#allocation12 + $0x30] sm:$0xff]  }
 0x211   : > { %v683_v24 = vadd.f32 1e-06, %v682_v23 }
 0x213   : > { %2352 = vrsqrt.f32 %v683_v24 }
 0x21d   : > { %v2353_v25 = vpop.eup %2352 }
 0x21e   : > { %v685_v27 = vmul.f32 %v2353_v25, %v678_v8  ;;  %v1259_v8 = vld [vmem:[#allocation11] sm:$0xff] }
 0x220   : > { %v693_v29 = vmul.f32 %v1968_v26, %v685_v27 }
 0x222   : > { %v3078_v30 = vadd.f32 %v1969_v28, %v693_v29 }
 0x224   : > { %v703_v31 = vpack.c.bf16 %v3078_v30, %v3078_v30 }
 0x226   : > { %833 = vmatmul.mubr.bf16.vlgmr.msra.gmra.mrb[0].mxu0 %v703_v31 }
 0x227   : > { %2065 = vmatpush3.bf16.msra.mxu0 %v2337_v10 }
 0x228   : > { %2066 = vmatprep.subr.bf16.mxu0 %v2338_v11 }
 0x22b   : > { %2067 = vmatpush3.bf16.msra.mxu0 %v2339_v12 }
 0x22c   : > { %2068 = vmatprep.subr.bf16.mxu0 %v2340_v13 }
 0x22f   : > { %2069 = vmatpush3.bf16.msra.mxu0 %v2341_v14 }
 0x230   : > { %2070 = vmatprep.subr.bf16.mxu0 %v2342_v15 }
 0x233   : > { %2071 = vmatpush3.bf16.msra.mxu0 %v2343_v16 }
 0x234   : > { %2072 = vmatprep.subr.bf16.mxu0 %v2344_v17 }
 0x237   : > { %2073 = vmatpush3.bf16.msra.mxu0 %v2345_v18 }
 0x238   : > { %2074 = vmatprep.subr.bf16.mxu0 %v2346_v19 }
 0x23b   : > { %2075 = vmatpush3.bf16.msra.mxu0 %v2347_v20 }
 0x23c   : > { %2076 = vmatprep.subr.bf16.mxu0 %v2348_v21 }
 0x23f   : > { %2077 = vmatpush3.bf16.msra.mxu0 %v2349_v22 }
 0x2f9   : > { %v834_v33 = vpop.f32.mrb[0].mxu0 }
 0x2fa   : > { %v836_v34 = vpop.f32.mrb[1].mxu0 }
 0x2fb   : > { %v838_v36 = vpop.f32.mrb[2].mxu0  ;;  %2092 = vmatprep.subr.mxu1 %v836_v34 }
 0x2fc   : > { %v839_v38 = vpop.f32.mrb[3].mxu0  ;;  %2093 = vmatpush3.msra.mxu1 %v836_v34  ;;  %v1260_v34 = vld [vmem:[#allocation11 + $0x8] sm:$0xff] }
 0x2fd   : > { %2095 = vmatmul.mubr.msk.f32.vlgmr.msra.gmra.mrb[0].mxu1 %vm849_vm0, %v846_v35  ;;  %2100 = vmatprep.subr.mxu1 %v834_v33  ;;  %v2650_v35 = vmov 0.0   ;;  %v2350_v36 = vld [vmem:[#allocation12 + $0x78] sm:$0xff]  }
 0x2fe   : > { %2101 = vmatpush3.msra.mxu1 %v834_v33  ;;  %2097 = vmatprep.mubr.msk.f32.mxu1 %vm849_vm0, %v847_v37  ;;  %v2351_v37 = vld [vmem:[#allocation12 + $0x38] sm:$0xff]  }
 0x2ff   : > { %2078 = vmatprep.subr.bf16.mxu0 %v2350_v36  ;;  %v1376_v38 = vld [vmem:[%s3288_s25] sm:$0xff]  ;;  %s1808_s25 = scalar_lea.sflag [#allocation5], %s3008_s22 }
 0x300   : > { %2079 = vmatpush3.bf16.msra.mxu0 %v2351_v37 }
 0x301   : > { %2098 = vmatmul.mubr.msk.f32.gmra.mrb[2].mxu1 %vm849_vm0, %v848_v39  ;;  %v1378_v39 = vld [vmem:[%s3289_s23] sm:$0xff]  ;;  %s3292_s23 = sld [smem:[#allocation32_spill]] }
 0x302   : > { %2102 = vmatprep.mubr.msk.f32.mxu1 %vm849_vm0, %v841_v40  ;;  %1381 = vperm.xlu1 %2310, %v1378_v39  }
 0x305   : > { %2103 = vmatmul.mubr.msk.f32.vlgmr.msra.gmra.mrb[0].mxu1 %vm849_vm0, %v842_v41 }
 0x306   : > { %2105 = vmatprep.mubr.msk.f32.mxu1 %vm849_vm0, %v843_v42 }
 0x309   : > { %2106 = vmatmul.mubr.msk.f32.gmra.mrb[2].mxu1 %vm849_vm0, %v844_v43 }
 0x30a   : > { %2116 = vmatprep.mubr.msk.f32.mxu1 %vm1052_vm1, %v1048_v44 }
 0x3d8   : > { %v2104_v45 = vpop.f32.mrb[0].mxu1 }
 0x3d9   : > { %v1045_v46 = vmax.f32 %v2104_v45, 0.0  ;;  %v1025_v47 = vpop.f32.mrb[1].mxu1  ;;  %v1382_v45 = vpop.permute.xlu1 %1381 }
 0x3da   : > { %v1044_v48 = vmax.f32 %v1025_v47, 0.0 }
 0x3dc   : > { %v2164_v49 = vpack.c.bf16 %v1045_v46, %v1044_v48  ;;  %v2107_v50 = vpop.f32.mrb[2].mxu1 }
 0x3dd   : > { %v1047_v51 = vmax.f32 %v2107_v50, 0.0  ;;  %v1035_v52 = vpop.f32.mrb[3].mxu1 }
 0x3de   : > { %v1046_v53 = vmax.f32 %v1035_v52, 0.0  ;;  %2165 = vmatprep.subr.bf16.mxu1 %v2164_v49 }
 0x3df   : > { %2167 = vmatpush3.bf16.msra.mxu1 %v2164_v49 }
 0x3e0   : > { %v2168_v54 = vpack.c.bf16 %v1047_v51, %v1046_v53  ;;  %v1623_v53 = vld [vmem:[%s3290_s11 + $0x8] sm:$0xff] }
 0x3e2   : > { %2169 = vmatprep.subr.bf16.mxu1 %v2168_v54 }
 0x3e3   : > { %2171 = vmatpush3.bf16.msra.mxu1 %v2168_v54 }
 0x3e6   : > { %2117 = vmatmul.mubr.msk.f32.vlgmr.msra.gmra.mrb[4].mxu1 %vm1052_vm1, %v1049_v55 }
 0x3e7   : > { %2119 = vmatprep.mubr.msk.f32.mxu1 %vm1052_vm1, %v1050_v56 }
 0x3ea   : > { %2120 = vmatmul.mubr.msk.f32.gmra.mrb[6].mxu1 %vm1052_vm1, %v1051_v57 }
 0x3eb   : > { %2130 = vmatprep.mubr.msk.f32.mxu1 %vm1052_vm1, %v1154_v58  ;;  %v1620_v58 = vld [vmem:[%s3291_s0] sm:$0xff] }
 0x4b9   : > { %v2118_v59 = vpop.f32.mrb[4].mxu1 }
 0x4ba   : > { %v1151_v60 = vmax.f32 %v2118_v59, 0.0  ;;  %v1131_v61 = vpop.f32.mrb[5].mxu1  ;;  %v1622_v59 = vld [vmem:[%s3290_s11] sm:$0xff] }
 0x4bb   : > { %v1150_v62 = vmax.f32 %v1131_v61, 0.0 }
 0x4bd   : > { %v2172_v63 = vpack.c.bf16 %v1151_v60, %v1150_v62  ;;  %v2121_v0 = vpop.f32.mrb[6].mxu1  ;;  %v1726_v60 = vld [vmem:[%s3292_s23] sm:$0xff]  ;;  %s2027_s23 = sshll.u32 %s2770_s1, 7  ;;  %s2558_s1 = scalar_lea.vmem %s3177_s19, 128 }
 0x4be   : > { %v1153_v1 = vmax.f32 %v2121_v0, 0.0  ;;  %v1141_v2 = vpop.f32.mrb[7].mxu1  ;;  %p2559_p6 = scmp.ne.s32.totalorder %s3177_s19, %s2558_s1 }
 0x4bf   : > { %v1152_v3 = vmax.f32 %v1141_v2, 0.0  ;;  %2173 = vmatprep.subr.bf16.mxu1 %v2172_v63 }
 0x4c0   : > { %2175 = vmatpush3.bf16.msra.mxu1 %v2172_v63  ;;  %p2560_p4 = pnand %p2559_p6, %p3296_p9 }
 0x4c1   : > { %v2176_v4 = vpack.c.bf16 %v1153_v1, %v1152_v3  ;;  %v2021_v1 = vld [vmem:[#allocation14] ss:$0 sm:$0xff]  ;;  %v2022_v3 = vld [vmem:[%s3293_s13] ss:$0 sm:$0xff] }
 0x4c2   : > { %p2561_p13 = pneg %p2560_p4 }
 0x4c3   : > { %2177 = vmatprep.subr.bf16.mxu1 %v2176_v4 }
 0x4c4   : > { %2179 = vmatpush3.bf16.msra.mxu1 %v2176_v4 }
 0x4c7   : > { %2131 = vmatmul.mubr.msk.f32.vlgmr.msra.gmra.mrb[8].mxu1 %vm1052_vm1, %v1155_v5 }
 0x4c8   : > { %2133 = vmatprep.mubr.msk.f32.mxu1 %vm1052_vm1, %v1156_v6  ;;  %v1621_v6 = vld [vmem:[%s3291_s0 + $0x8] sm:$0xff]  ;;  %s3175_s0 = scalar_lea.hbm %s3295_s17, %s2027_s23 }
 0x4cb   : > { %2134 = vmatmul.mubr.msk.f32.gmra.mrb[10].mxu1 %vm1052_vm1, %v1157_v7  ;;  %v2652_v7 = vmov 0.0|0.0  }
 0x4cc   : > { %2144 = vmatprep.mubr.msk.f32.mxu1 %vm1052_vm1, %v1259_v8 }
 0x59a   : > { %v2132_v23 = vpop.f32.mrb[8].mxu1 }
 0x59b   : > { %v1256_v24 = vmax.f32 %v2132_v23, 0.0  ;;  %v1236_v25 = vpop.f32.mrb[9].mxu1 }
 0x59c   : > { %v1255_v26 = vmax.f32 %v1236_v25, 0.0  ;;  %v1725_v25 = vld [vmem:[%s3294_s7] sm:$0xff]  ;;  %s2564_s7 = scalar_lea.vmem %s2563_s20, 256 }
 0x59d   : > { %p2566_p3 = scmp.lt.s32.totalorder %s2564_s7, %s2558_s1 }
 0x59e   : > { %v2180_v27 = vpack.c.bf16 %v1256_v24, %v1255_v26  ;;  %v2135_v28 = vpop.f32.mrb[10].mxu1 }
 0x59f   : > { %v1258_v29 = vmax.f32 %v2135_v28, 0.0  ;;  %v1246_v31 = vpop.f32.mrb[11].mxu1  ;;  %p2567_p2 = por %p2566_p3, %p2565_p1 }
 0x5a0   : > { %v1257_v32 = vmax.f32 %v1246_v31, 0.0  ;;  %2181 = vmatprep.subr.bf16.mxu1 %v2180_v27 }
 0x5a1   : > { %2183 = vmatpush3.bf16.msra.mxu1 %v2180_v27  ;;  %p2568_p0 = pnand %p2567_p2, %p2561_p13 }
 0x5a2   : > { %v2184_v33 = vpack.c.bf16 %v1258_v29, %v1257_v32 }
 0x5a4   : > { %2185 = vmatprep.subr.bf16.mxu1 %v2184_v33 }
 0x5a5   : > { %2187 = vmatpush3.bf16.msra.mxu1 %v2184_v33 }
 0x5a6   : > { %2147 = vmatprep.subr.mxu1 %v2650_v35 }
 0x5a8   : > { %2145 = vmatmul.mubr.msk.f32.vlgmr.msra.gmra.mrb[12].mxu1 %vm1052_vm1, %v1260_v34 }
 0x5a9   : > { %2148 = vmatpush3.msra.mxu1 %v3078_v30  ;;  %2149 = vmatprep.mubr.msk.f32.mxu1 %vm2651_vm2, %v2650_v35 }
 0x5ac   : > { %2150 = vmatmul.mubr.msk.f32.vlgmr.msra.gmra.mrb[14].mxu1 %vm849_vm0, %v1376_v38 }
 0x5ad   : > { %2154 = vmatprep.mubr.msk.f32.mxu1 %vm849_vm0, %v1620_v58 }
 0x67b   : > { %v2146_v40 = vpop.f32.mrb[12].mxu1 }
 0x67c   : > { %v1343_v30 = vpack.c.bf16 %v2146_v40, %v2146_v40  ;;  %v1333_v41 = vpop.f32.mrb[13].mxu1 }
 0x67d   : > { %v1342_v42 = vpack.c.bf16 %v1333_v41, %v1333_v41 }
 0x67e   : > { %1585 = vmatprep.mubr.bf16.mxu0 %v1343_v30 }
 0x67f   : > { %1586 = vmatmul.mubr.bf16.vlgmr.msra.gmra.mrb[4].mxu0 %v1342_v42  ;;  %v1453_v43 = vpop.f32.mrb[14].mxu1 }
 0x680   : > { %v2151_v44 = vpop.f32.mrb[15].mxu1  ;;  %v1454_v47 = vadd.f32 %v1453_v43, %v1382_v45 }
 0x752   : > { %v2080_v46 = vpop.f32.mrb[4].mxu0 }
 0x753   : > { %v2081_v48 = vpop.f32.mrb[5].mxu0 }
 0x754   : > { %v2082_v49 = vadd.f32 %v2081_v48, %v2080_v46  ;;  %v2083_v50 = vpop.f32.mrb[6].mxu0 }
 0x755   : > { %v2084_v51 = vpop.f32.mrb[7].mxu0 }
 0x756   : > { %v1588_v52 = vadd.f32 %v2082_v49, %v1454_v47 }
 0x758   : > { %1593 = vadd.xlane.f32.xlu1 %v1588_v52 }
 0x769   : > { %1631 = vperm.xlu1 %2310, %v1623_v53  }
 0x7e5   : > { %v1594_v54 = vpop.xlane.xlu1 %1593 }
 0x7e6   : > { %v1595_v55 = vmul.f32 0.0078125, %v1594_v54 }
 0x7e8   : > { %v1596_v56 = vsub.f32 %v1588_v52, %v1595_v55 }
 0x7e9   : > { %v1632_v8 = vpop.permute.xlu1 %1631 }
 0x7ea   : > { %v1597_v57 = vmul.f32 %v1596_v56, %v1596_v56 }
 0x7ec   : > { %1598 = vadd.xlane.f32.xlu0 %v1597_v57 }
 0x802   : > { %1626 = vperm.xlu0 %2311, %v1622_v59  }
 0x806   : > { %1729 = vperm.xlu0 %2311, %v1726_v60  }
 0x879   : > { %v1599_v61 = vpop.xlane.xlu0 %1598 }
 0x87a   : > { %v1600_v62 = vmul.f32 0.0078125, %v1599_v61 }
 0x87c   : > { %v1601_v63 = vadd.f32 1e-06, %v1600_v62 }
 0x87e   : > { %2354 = vrsqrt.f32 %v1601_v63 }
 0x881   : > { %v1627_v10 = vpop.permute.xlu0 %1626 }
 0x885   : > { %v1730_v26 = vpop.permute.xlu0 %1729 }
 0x888   : > { %v2355_v0 = vpop.eup %2354 }
 0x889   : > { %v1603_v2 = vmul.f32 %v2355_v0, %v1596_v56 }
 0x88b   : > { %v1611_v4 = vmul.f32 %v2021_v1, %v1603_v2 }
 0x88d   : > { %v1619_v5 = vadd.f32 %v2022_v3, %v1611_v4 }
 0x88f   : > { %2152 = vmatprep.subr.mxu1 %v1619_v5 }
 0x890   : > { %2153 = vmatpush3.msra.mxu1 %v1619_v5 }
 0x891   : > { %2155 = vmatmul.mubr.msk.f32.vlgmr.msra.gmra.mrb[16].mxu1 %vm849_vm0, %v1621_v6  ;;  %2188 = vmatprep.subr.bf16.mxu1 %v2652_v7 }
 0x892   : > { %2161 = vmatprep.mubr.msk.f32.mxu1 %vm2651_vm2, %v2650_v35 }
 0x964   : > { %v2156_v9 = vpop.f32.mrb[16].mxu1 }
 0x965   : > { %v1712_v11 = vadd.f32 %v2156_v9, %v1632_v8  ;;  %v1706_v12 = vpop.f32.mrb[17].mxu1 }
 0x966   : > { %v1707_v13 = vadd.f32 %v1706_v12, %v1627_v10 }
 0x967   : > { %v1718_v14 = vmul.f32 0.70710677, %v1712_v11  ;;  %v1716_v18 = vmul.f32 0.5, %v1712_v11 }
 0x968   : > { %v1717_v15 = vmul.f32 0.70710677, %v1707_v13  ;;  %v1715_v20 = vmul.f32 0.5, %v1707_v13 }
 0x969   : > { %2356 = verf.f32 %v1718_v14 }
 0x96a   : > { %2358 = verf.f32 %v1717_v15 }
 0x973   : > { %v2357_v16 = vpop.eup %2356 }
 0x974   : > { %v2359_v17 = vpop.eup %2358  ;;  %v1722_v19 = vadd.f32 1.0, %v2357_v16 }
 0x975   : > { %v1721_v21 = vadd.f32 1.0, %v2359_v17 }
 0x976   : > { %v1724_v22 = vmul.f32 %v1722_v19, %v1716_v18 }
 0x977   : > { %v1723_v23 = vmul.f32 %v1721_v21, %v1715_v20 }
 0x979   : > { %v2189_v24 = vpack.c.bf16 %v1724_v22, %v1723_v23 }
 0x97b   : > { %2190 = vmatpush3.bf16.msra.mxu1 %v2189_v24 }
 0x97e   : > { %2162 = vmatmul.mubr.msk.f32.vlgmr.msra.gmra.mrb[18].mxu1 %vm1732_vm3, %v1725_v25 }
 0xa51   : > { %v1802_v27 = vpop.f32.mrb[18].mxu1 }
 0xa52   : > { %v1803_v28 = vadd.f32 %v1802_v27, %v1730_v26  ;;  %v2163_v29 = vpop.f32.mrb[19].mxu1 }
 0xa54   : > { %1806 = vst [vmem:[%s671_s21] sm:$0xff] %v1803_v28 }
 0xa55   : > { %2571 = shalt.err (!%p2568_p0)
}
 0xa56   : > { %s2572_s22 = scalar_lea.hbm %s3175_s0, 128  ;;  %s2576_s13 = scalar_lea.hbm %s3295_s17, 256 }
 0xa57   : > { %p2573_p10 = scmp.ne.s32.totalorder %s3175_s0, %s2572_s22  ;;  %p2577_p8 = scmp.lt.u32.totalorder %s3175_s0, %s3295_s17 }
 0xa58   : > { %p2578_p5 = scmp.lt.u32.totalorder %s2576_s13, %s2572_s22  ;;  %p2580_p6 = scmp.lt.u32.totalorder %s2572_s22, %s3175_s0 }
 0xa59   : > { %p2574_p11 = pnand %p2573_p10, %p3296_p9 }
 0xa5a   : > { %p2579_p7 = por %p2578_p5, %p2577_p8 }
 0xa5b   : > { %p2575_p12 = pneg %p2574_p11 }
 0xa5c   : > { %p2581_p4 = por %p2580_p6, %p2579_p7 }
 0xa5e   : > { %p2582_p13 = pnand %p2581_p4, %p2575_p12 }
 0xa60   : > { %2585 = shalt.err (!%p2582_p13)
}
 0xa61   : > { %2221 = dma.vmem_to_hbm [thread:$0]  (%p3296_p9), %s3177_s19, 128, %s3175_s0, %s1808_s25  }
 0xa62 PF: > { %s1833_s1 = sand.u32 1, %s2624_s27   ;;  %p3297_p1 = scmp.ne.s32.totalorder %s3277_s10, 0 }
 0xa63   : > { %p3298_p3 = scmp.ge.s32.totalorder %s2636_s30, 2  ;;  %s1834_s20 = scalar_lea.sflag [#allocation5], %s1833_s1 }
 0xa65   : > { %p2247_p2 = pnand %p3298_p3, %p3297_p1 }
 0xa67   : > { %2619 = dma.done.wait (!%p2247_p2), %s1834_s20, 128  }
 0xa68   : > { %2621 = vsyncadd (!%p2247_p2), %s1834_s20, 4294967168  ;;  %p34_p0 = scmp.ge.s32.totalorder %s2932_s2, 4   ;;  %s3299_s27 = smov %s2628_s28 }
 0xa69   : > { %s3300_s28 = smov %s2632_s29  ;;  %s3301_s29 = smov %s2943_s24 }
 0xa6a   : > { %s3302_s30 = smov %s2932_s2  ;;  %36 = sbr.rel (!%p34_p0) target bundleno = 22 (0x16), region = 161 }
 0xa71   :  { %1839 = vsyncpa [#allocation4], 1 }
 0xa72   :  { %1841 = vsyncpa [#allocation4 + $0x1], 1 }
 0xa73   :  { %1842 = vsyncpa [#allocation7], 1 }
 0xa74   :  { %1843 = vsyncpa [#allocation10], 1 }
 0xa75   :  { %1844 = vsyncpa [#allocation13], 1 }
 0xa76   :  { %1845 = vsyncpa [#allocation5], 1 }
 0xa77   :  { %1847 = vsyncpa [#allocation5 + $0x1], 1 }

</bundles_post_ra>
